<compile_context>
chip_gen: v7x
topology: tpu7x:2x2x1
jax: 0.10.0
libtpu: 0.0.40
codegen_flags: <defaults>
</compile_context>

<pallas_src>
import jax
import jax.numpy as jnp
from jax.experimental import pallas as pl
from jax.experimental.pallas import tpu as pltpu

NUM_LABELS = 47
IN_FEATURES = 4096 * 4  # 16384


def _linear_kernel(x_ref, w_ref, o_ref):
    """One K-tile of a partial y_c = x[:, Kc] @ w_t[Kc, :], accumulated in o_ref."""
    k = pl.program_id(1)

    @pl.when(k == 0)
    def _():
        o_ref[...] = jnp.zeros_like(o_ref)

    o_ref[...] += jnp.dot(
        x_ref[...], w_ref[...], preferred_element_type=jnp.float32
    )[None]


def linear_pallas(x, w_t, b, *, tk=4096, n_split=2):
    """Compute x @ w_t + b with a Pallas TPU kernel.

    x:   (B, K) float32
    w_t: (K, N) float32  (pre-transposed nn.Linear weight, staged once)
    b:   (N,)   float32
    returns (B, N) float32
    """
    B, K = x.shape
    Kw, N = w_t.shape
    assert K == Kw
    assert K % (n_split * tk) == 0
    kt = K // (n_split * tk)  # K-steps per parallel chunk

    partials = pl.pallas_call(
        _linear_kernel,
        out_shape=jax.ShapeDtypeStruct((n_split, B, N), jnp.float32),
        grid_spec=pltpu.PrefetchScalarGridSpec(
            num_scalar_prefetch=0,
            grid=(n_split, kt),
            in_specs=[
                # (B, tk): B equals the full array dim -> legal without padding.
                pl.BlockSpec((B, tk), lambda c, k: (0, c * kt + k)),
                # (tk, N): N equals the full array dim -> no 47->128 lane pad.
                pl.BlockSpec((tk, N), lambda c, k: (c * kt + k, 0)),
            ],
            out_specs=pl.BlockSpec((1, B, N), lambda c, k: (c, 0, 0)),
        ),
        compiler_params=pltpu.CompilerParams(
            dimension_semantics=("parallel", "arbitrary"),
        ),
    )(x, w_t)

    # Tiny (n_split, B, 47) reduction + bias add; fused by XLA in the wrapper.
    return jnp.sum(partials, axis=0) + b


class NetPallas:
    """JAX/Pallas port of the PyTorch `Net` module (a single Linear layer)."""

    def __init__(self, key):
        k_w, k_b = jax.random.split(key)
        # Deterministic init mirroring nn.Linear's default U(-1/sqrt(fan_in), 1/sqrt(fan_in)).
        bound = 1.0 / jnp.sqrt(jnp.float32(IN_FEATURES))
        self.weight = jax.random.uniform(
            k_w, (NUM_LABELS, IN_FEATURES), jnp.float32, -bound, bound
        )
        self.bias = jax.random.uniform(
            k_b, (NUM_LABELS,), jnp.float32, -bound, bound
        )
        # Stage the pre-transposed weight ONCE (hot path never re-transposes/pads).
        self.weight_t = jnp.asarray(self.weight.T)  # (K, N) = (16384, 47)

    def __call__(self, x):
        return linear_pallas(x, self.weight_t, self.bias)


if __name__ == "__main__":
    key = jax.random.PRNGKey(0)
    k_param, k_x = jax.random.split(key)

    net = NetPallas(k_param)

    batch = 2
    x = jax.random.normal(k_x, (batch, IN_FEATURES), jnp.float32)

    y = jax.jit(net.__call__)(x)
    y = jax.block_until_ready(y)

    # Cross-check against plain-JAX reference of the same math.
    y_ref = x @ net.weight.T + net.bias
    assert y.shape == (batch, NUM_LABELS), y.shape
    assert jnp.allclose(y, y_ref, atol=1e-3, rtol=1e-3), (
        float(jnp.max(jnp.abs(y - y_ref)))
    )

    print("KERNEL_OK")
</pallas_src>

<mosaic_0001>
module attributes {stable_mosaic.version = 11 : i64} {
  func.func @_linear_kernel(%arg0: i32, %arg1: i32, %arg2: memref<2x4096xf32, #tpu.memory_space<vmem>>, %arg3: memref<4096x47xf32, #tpu.memory_space<vmem>>, %arg4: memref<1x2x47xf32, #tpu.memory_space<vmem>>) attributes {dimension_semantics = [#tpu.dimension_semantics<parallel>, #tpu.dimension_semantics<arbitrary>], iteration_bounds = array<i64: 2, 2>, scalar_prefetch = 0 : i64, scratch_operands = 0 : i64, tpu.core_type = #tpu.core_type<tc>, window_params = [{transform_indices = @transform_0, window_bounds = array<i64: 2, 4096>}, {transform_indices = @transform_1, window_bounds = array<i64: 4096, 47>}, {transform_indices = @transform_2, window_bounds = array<i64: 1, 2, 47>}]} {
    %c0_i32 = arith.constant 0 : i32
    %0 = arith.cmpi eq, %arg1, %c0_i32 : i32
    %1 = arith.extui %0 : i1 to i32
    %c0_i32_0 = arith.constant 0 : i32
    %2 = arith.cmpi ne, %1, %c0_i32_0 : i32
    scf.if %2 {
      %cst_10 = arith.constant 0.000000e+00 : f32
      %10 = vector.broadcast %cst_10 : f32 to vector<1x2x47xf32>
      %c0_11 = arith.constant 0 : index
      %c0_12 = arith.constant 0 : index
      %c0_13 = arith.constant 0 : index
      %11 = vector.load %arg4[%c0_11, %c0_12, %c0_13] : memref<1x2x47xf32, #tpu.memory_space<vmem>>, vector<1x2x47xf32>
      tpu.vector_store %arg4[%c0_11, %c0_12, %c0_13], %10 {strides = array<i32>} : memref<1x2x47xf32, #tpu.memory_space<vmem>>, vector<1x2x47xf32>,
    } else {
    }
    %c0 = arith.constant 0 : index
    %c0_1 = arith.constant 0 : index
    %c0_2 = arith.constant 0 : index
    %3 = vector.load %arg4[%c0, %c0_1, %c0_2] : memref<1x2x47xf32, #tpu.memory_space<vmem>>, vector<1x2x47xf32>
    %c0_3 = arith.constant 0 : index
    %c0_4 = arith.constant 0 : index
    %4 = vector.load %arg2[%c0_3, %c0_4] : memref<2x4096xf32, #tpu.memory_space<vmem>>, vector<2x4096xf32>
    %c0_5 = arith.constant 0 : index
    %c0_6 = arith.constant 0 : index
    %5 = vector.load %arg3[%c0_5, %c0_6] : memref<4096x47xf32, #tpu.memory_space<vmem>>, vector<4096x47xf32>
    %cst = arith.constant dense<0.000000e+00> : vector<2x47xf32>
    %6 = tpu.matmul %4, %5, %cst {dimension_numbers = #tpu.dot_dimension_numbers<[1], [0], [0], [1], [0, 0, 1, 1], [], []>} : vector<2x4096xf32>, vector<4096x47xf32>, vector<2x47xf32> -> vector<2x47xf32>
    %7 = vector.shape_cast %6 : vector<2x47xf32> to vector<1x2x47xf32>
    %8 = arith.addf %3, %7 : vector<1x2x47xf32>
    %c0_7 = arith.constant 0 : index
    %c0_8 = arith.constant 0 : index
    %c0_9 = arith.constant 0 : index
    %9 = vector.load %arg4[%c0_7, %c0_8, %c0_9] : memref<1x2x47xf32, #tpu.memory_space<vmem>>, vector<1x2x47xf32>
    tpu.vector_store %arg4[%c0_7, %c0_8, %c0_9], %8 {strides = array<i32>} : memref<1x2x47xf32, #tpu.memory_space<vmem>>, vector<1x2x47xf32>,
    return
  }
  func.func @transform_0(%arg0: i32, %arg1: i32) -> (i32, i32) {
    %c2_i32 = arith.constant 2 : i32
    %0 = arith.muli %arg0, %c2_i32 : i32
    %1 = arith.addi %0, %arg1 : i32
    %c0_i32 = arith.constant 0 : i32
    %c0_i32_0 = arith.constant 0 : i32
    return %c0_i32, %1 : i32, i32
  }
  func.func @transform_1(%arg0: i32, %arg1: i32) -> (i32, i32) {
    %c2_i32 = arith.constant 2 : i32
    %0 = arith.muli %arg0, %c2_i32 : i32
    %1 = arith.addi %0, %arg1 : i32
    %c0_i32 = arith.constant 0 : i32
    %c0_i32_0 = arith.constant 0 : i32
    return %1, %c0_i32 : i32, i32
  }
  func.func @transform_2(%arg0: i32, %arg1: i32) -> (i32, i32, i32) {
    %c0_i32 = arith.constant 0 : i32
    %c0_i32_0 = arith.constant 0 : i32
    %c0_i32_1 = arith.constant 0 : i32
    return %arg0, %c0_i32, %c0_i32_0 : i32, i32, i32
  }
}

</mosaic_0001>

<bundles_post_ra>
// kernel: a_call__.1
= control target key start
LH: loop header
LB: loop body
LE: loop exit
PB: predicated region body
PF: predicated region fallthrough
CT: control target
= control target key end

     0   :  { %7 = vsyncpa [#allocation3], 0  ;;  %s4314_s0 = inlined_call_operand.hbm [shape: f32[2,16384], index: 0, kind: input, shape index: {}]   ;;  %s4315_s1 = inlined_call_operand.hbm [shape: f32[16384,47], index: 1, kind: input, shape index: {}]   ;;  %s4316_s2 = inlined_call_operand.vmem [shape: f32[2,2,47], index: 2, kind: output, shape index: {}]  }
   0x1   :  { %9 = vsyncpa [#allocation3 + $0x1], 0 }
   0x2   :  { %10 = vsyncpa [#allocation5], 0 }
   0x3   :  { %12 = vsyncpa [#allocation5 + $0x1], 0  ;;  %s3497_s9 = smov 0   ;;  %s3499_s10 = smov 0  }
   0x4   :  { %s3501_s11 = smov 0   ;;  %s3503_s12 = smov 0  }
   0x5   :  { %s3505_s13 = smov 0   ;;  %s3507_s14 = smov 0  }
   0x6   :  { %s3509_s15 = smov 0   ;;  %s3511_s16 = smov 0  }
   0x7 LB: > { %s2159_s17 = sadd.s32 4294967295, %s3474_s16   ;;  %s27_s18 = sadd.s32 1, %s3466_s14  ;;  %s3474_s16 = sphi %s3511_s16, %s18_s16   ;;  %s3470_s15 = sphi %s3509_s15, %s4330_s15   ;;  %s3466_s14 = sphi %s3507_s14, %s4329_s14   ;;  %s3462_s13 = sphi %s3505_s13, %s4328_s13   ;;  %s3458_s12 = sphi %s3503_s12, %s4327_s12   ;;  %s3454_s11 = sphi %s3501_s11, %s4326_s11   ;;  %s3450_s10 = sphi %s3499_s10, %s4325_s10   ;;  %s3446_s9 = sphi %s3497_s9, %s4324_s9  }
   0x8   : > { %p28_p0 = scmp.ge.s32.totalorder %s27_s18, 2  ;;  %s30_s19 = sadd.s32 1, %s3470_s15 }
   0x9   : > { %s2161_s20 = sshll.u32 %s3470_s15, 1  ;;  %s41_s21 = sadd.s32 1, %s3454_s11 }
   0xa   : > { %s4332_s18 = smov (%p28_p0, %s27_s18), 0  ;;  %s4334_s19 = smov (!%p28_p0, %s30_s19), %s3470_s15 }
   0xb   : > { %s3544_s22 = sadd.s32 %s3466_s14, %s2161_s20  ;;  %p48_p1 = scmp.ne.s32.totalorder %s3454_s11, %s3450_s10 }
   0xc   : > { %p32_p2 = scmp.ge.s32.totalorder %s4334_s19, 2  ;;  %p49_p3 = scmp.eq.s32.totalorder %s3474_s16, 0 }
   0xd   : > { %p54_p4 = scmp.ne.s32.totalorder %s3450_s10, %s3446_s9  ;;  %p55_p5 = scmp.eq.s32.totalorder %s2159_s17, 0 }
   0xe   : > { %s4336_s19 = smov (%p32_p2, %s4334_s19), 0  ;;  %p3552_p6 = por %p49_p3, %p48_p1 }
   0xf   : > { %p3556_p7 = por %p55_p5, %p54_p4  ;;  %s2162_s25 = sshll.u32 %s4336_s19, 1 }
  0x10   : > { %s37_s26 = sadd.s32 %s2162_s25, %s4332_s18  ;;  %p3267_p8 = scmp.lt.s32.totalorder %s3474_s16, 4 }
  0x11   : > { %s4319_s24 = scalar_select %p3556_p7, 1, 0 }
  0x12   : > { %s38_s27 = ssub.s32 %s3544_s22, %s37_s26  ;;  %s3565_s28 = sand.u32 1, %s3454_s11  }
  0x13   : > { %p39_p9 = scmp.eq.s32.totalorder %s38_s27, 0  ;;  %s2167_s29 = sshll.u32 %s3565_s28, 6 }
  0x14   : > { %s2182_s30 = sshll.u32 %s3544_s22, 10  ;;  %s138_s7 = scalar_lea.vmem [#allocation2], %s2167_s29 }
  0x15   : > { %s3570_s3 = scalar_select %p39_p9, %s3454_s11, %s41_s21  }
  0x16   : > { %s3575_s6 = scalar_lea.hbm %s4314_s0, %s2182_s30  ;;  %s148_s8 = sshll.u32 %s138_s7, 4  ;;  %s3583_s8 = int_to_ptr.vmem [resolvable:$true] %s148_s8 }
  0x17   : > { %p3579_p10 = pnand %p3267_p8, %p3552_p6  ;;  %s2183_s17 = sshll.u32 %s3544_s22, 16 }
  0x18   : > { %s135_s20 = scalar_lea.sflag [#allocation3], %s3565_s28  ;;  %s3344_s21 = scalar_lea.hbm %s3575_s6, 1024 }
  0x19   : > { %p3345_p12 = scmp.ne.s32.totalorder %s3575_s6, %s3344_s21  ;;  %p3346_p13 = pneg %p3579_p10 }
  0x1a   : > { %s3349_s26 = scalar_lea.hbm %s4314_s0, 4096  ;;  %p3350_p2 = scmp.lt.u32.totalorder %s3575_s6, %s4314_s0 }
  0x1b   : > { %p3347_p0 = pnand %p3346_p13, %p3345_p12  ;;  %p3351_p3 = scmp.lt.u32.totalorder %s3349_s26, %s3344_s21 }
  0x1c   : > { %p3353_p5 = scmp.lt.u32.totalorder %s3344_s21, %s3575_s6 }
  0x1d   : > { %p3348_p1 = pneg %p3347_p0  ;;  %p3352_p4 = por %p3351_p3, %p3350_p2 }
  0x1f   : > { %p3354_p6 = por %p3353_p5, %p3352_p4 }
  0x21   : > { %p3355_p8 = pnand %p3354_p6, %p3348_p1 }
  0x23   : > { %3358 = shalt.err (!%p3355_p8)
}
  0x24   : > { %s3359_s30 = scalar_lea.vmem %s3583_s8, 1024  ;;  %s3476_s4 = smov [#allocation2]  }
  0x25   : > { %p3360_p9 = scmp.ne.s32.totalorder %s3583_s8, %s3359_s30  ;;  %s3364_s5 = sshll.u32 %s3476_s4, 4  ;;  %s3365_s5 = int_to_ptr.vmem [resolvable:$false] %s3364_s5 }
  0x26   : > { %s3366_s7 = scalar_lea.vmem %s3365_s5, 2048  ;;  %p3367_p11 = scmp.lt.s32.totalorder %s3583_s8, %s3365_s5 }
  0x27   : > { %p3362_p12 = pnand %p3360_p9, %p3346_p13  ;;  %p3368_p2 = scmp.lt.s32.totalorder %s3366_s7, %s3359_s30 }
  0x29   : > { %p3363_p0 = pneg %p3362_p12  ;;  %p3369_p3 = por %p3368_p2, %p3367_p11 }
  0x2b   : > { %p3370_p4 = pnand %p3369_p3, %p3363_p0 }
  0x2d   : > { %3373 = shalt.err (!%p3370_p4)
}
  0x2e   : > { %3263 = dma.hbm_to_vmem [thread:$0]  (!%p3579_p10), %s3575_s6, 1024, %s3583_s8, %s135_s20  }
  0x2f   : > { %p176_p1 = scmp.lt.s32.totalorder %s3474_s16, 5  ;;  %s2171_s21 = sshll.u32 %s3565_s28, 12 }
  0x30   : > { %s3620_s26 = scalar_lea.hbm %s4315_s1, %s2183_s17  ;;  %p4321_p11 = scmp.ge.s32.totalorder %s3474_s16, 1 }
  0x31   : > { %s159_s29 = scalar_lea.vmem [#allocation4], %s2171_s21  ;;  %s156_s6 = scalar_lea.sflag [#allocation5], %s3565_s28 }
  0x32   : > { %p3624_p5 = pnand %p4321_p11, %p176_p1  ;;  %s168_s30 = sshll.u32 %s159_s29, 4  ;;  %s3628_s30 = int_to_ptr.vmem [resolvable:$true] %s168_s30 }
  0x33   : > { %s3374_s22 = scalar_lea.hbm %s3620_s26, 65536  ;;  %s3379_s20 = scalar_lea.hbm %s4315_s1, 262144 }
  0x34   : > { %p3375_p6 = scmp.ne.s32.totalorder %s3620_s26, %s3374_s22  ;;  %p3380_p12 = scmp.lt.u32.totalorder %s3620_s26, %s4315_s1 }
  0x35   : > { %p3381_p0 = scmp.lt.u32.totalorder %s3379_s20, %s3374_s22  ;;  %p3383_p3 = scmp.lt.u32.totalorder %s3374_s22, %s3620_s26 }
  0x36   : > { %p3377_p8 = pnand %p3375_p6, %p3346_p13 }
  0x37   : > { %p3382_p2 = por %p3381_p0, %p3380_p12 }
  0x38   : > { %p3378_p9 = pneg %p3377_p8 }
  0x39   : > { %p3384_p4 = por %p3383_p3, %p3382_p2 }
  0x3b   : > { %p3385_p1 = pnand %p3384_p4, %p3378_p9 }
  0x3d   : > { %3388 = shalt.err (!%p3385_p1)
}
  0x3e   : > { %s3389_s7 = scalar_lea.vmem %s3628_s30, 65536  ;;  %s3477_s21 = smov [#allocation4]  }
  0x3f   : > { %p3390_p11 = scmp.ne.s32.totalorder %s3628_s30, %s3389_s7  ;;  %s3394_s23 = sshll.u32 %s3477_s21, 4  ;;  %s3395_s23 = int_to_ptr.vmem [resolvable:$false] %s3394_s23 }
  0x40   : > { %s3396_s25 = scalar_lea.vmem %s3395_s23, 131072  ;;  %p3397_p7 = scmp.lt.s32.totalorder %s3628_s30, %s3395_s23 }
  0x41   : > { %p3392_p6 = pnand %p3390_p11, %p3346_p13  ;;  %p3398_p12 = scmp.lt.s32.totalorder %s3396_s25, %s3389_s7 }
  0x43   : > { %p3393_p8 = pneg %p3392_p6  ;;  %p3399_p0 = por %p3398_p12, %p3397_p7 }
  0x45   : > { %p3400_p2 = pnand %p3399_p0, %p3393_p8 }
  0x47   : > { %3403 = shalt.err (!%p3400_p2)
}
  0x48   : > { %s3478_s29 = smov 128   ;;  %s3479_s22 = smov 8  }
  0x49   : > { %3266 = dma.hbm_to_vmem [thread:$0]  (!%p3579_p10), %s3620_s26, 65536, %s3628_s30, %s156_s6, %s3478_s29, %s3478_s29, %s3479_s22  }
  0x4a   : > { %180 = sbr.rel (%p3624_p5) target bundleno = 576 (0x240), region = 28  ;;  %s182_s8 = sand.u32 (!%p3624_p5), 1, %s3450_s10  }
  0x4b   : > { %s2176_s17 = sshll.u32 (!%p3624_p5), %s182_s8, 6  ;;  %s183_s20 = scalar_lea.sflag (!%p3624_p5), [#allocation3], %s182_s8 }
  0x4c   : > { %s3659_s4 = scalar_lea.vmem (!%p3624_p5), [#allocation2], %s2176_s17  ;;  %p4323_p7 = scmp.ne.s32.totalorder (!%p3624_p5), %s4319_s24, 0 }
  0x51   : > { %3437 = dma.done.wait (%p4323_p7), %s183_s20, 1024  }
  0x52   : > { %3439 = vsyncadd (%p4323_p7), %s183_s20, 4294966272  ;;  %s2177_s5 = sshll.u32 %s182_s8, 12  ;;  %s192_s9 = scalar_lea.sflag [#allocation5], %s182_s8 }
  0x53   : > { %s3665_s28 = scalar_lea.vmem [#allocation4], %s2177_s5 }
  0x54   : > { %3441 = dma.done.wait (%p4323_p7), %s192_s9, 65536  }
  0x55   : > { %3443 = vsyncadd (%p4323_p7), %s192_s9, 4294901760  ;;  %p226_p10 = scmp.lt.s32.totalorder %s3462_s13, 1  ;;  %p2179_p13 = scmp.ne.s32.totalorder %s3458_s12, 0 }
  0x56   : > { %vm234_vm0 = vcmask (!%p2179_p13), 377856   ;;  %v3480_v0 = vmov (!%p2179_p13), 0.0  }
  0x57   : > { %s4338_s13 = smov (!%p226_p10, %s3462_s13), 1  ;;  %233 = sbr.rel (%p2179_p13) target bundleno = 94 (0x5e), region = 40 }
  0x58   : > { %s2178_s26 = sshll.u32 %s4338_s13, 1 }
  0x59   : > { %s3676_s6 = scalar_lea.vmem %s4316_s2, %s2178_s26 }
  0x5a   : > { %235 = vst.msk [vmem:[%s3676_s6] sm:$0x3] (!%p2179_p13), %vm234_vm0, %v3480_v0 }
  0x5e PF: > { %v261_v1 = vld [vmem:[%s3665_s28 + $0x80] sm:$0xff]  ;;  %v262_v2 = vld [vmem:[%s3665_s28 + $0x88] sm:$0xff]  ;;  %v263_v12 = vld [vmem:[%s3665_s28 + $0x90] sm:$0xff]  ;;  %v3481_v48 = vmov 1983009808   ;;  %v769_v50 = vlaneseq  ;;  %vm2054_vm1 = vcmask 377856  }
  0x5f   : > { %v293_v3 = vld [vmem:[%s3665_s28 + $0x180] sm:$0xff]  ;;  %v2744_v4 = vpack.c.bf16 %v262_v2, %v261_v1  ;;  %v294_v5 = vld [vmem:[%s3665_s28 + $0x188] sm:$0xff]  ;;  %v264_v14 = vld [vmem:[%s3665_s28 + $0x98] sm:$0xff]  ;;  %v767_v49 = vunpack.c.l.s4 %v3481_v48 }
  0x60   : > { %v245_v6 = vld [vmem:[%s3665_s28] sm:$0xff]  ;;  %v246_v7 = vld [vmem:[%s3665_s28 + $0x8] sm:$0xff]  ;;  %v2776_v8 = vpack.c.bf16 %v294_v5, %v293_v3  ;;  %v295_v15 = vld [vmem:[%s3665_s28 + $0x190] sm:$0xff]  ;;  %v2748_v17 = vpack.c.bf16 %v264_v14, %v263_v12  ;;  %v770_v1 = vshrl.u32 %v769_v50, 7 }
  0x61   : > { %v2746_v9 = vpack.c.bf16 %v246_v7, %v245_v6  ;;  %v277_v10 = vld [vmem:[%s3665_s28 + $0x100] sm:$0xff]  ;;  %v278_v11 = vld [vmem:[%s3665_s28 + $0x108] sm:$0xff]  ;;  %2745 = vmatprep.subr.bf16.mxu0 %v2744_v4  ;;  %v296_v16 = vld [vmem:[%s3665_s28 + $0x198] sm:$0xff]  ;;  %v768_v0 = vunpack.c.0.s8 %v767_v49 }
  0x62   : > { %v2778_v13 = vpack.c.bf16 %v278_v11, %v277_v10  ;;  %2777 = vmatprep.subr.bf16.mxu1 %v2776_v8  ;;  %v2780_v18 = vpack.c.bf16 %v296_v16, %v295_v15  ;;  %v247_v19 = vld [vmem:[%s3665_s28 + $0x10] sm:$0xff]  ;;  %v248_v20 = vld [vmem:[%s3665_s28 + $0x18] sm:$0xff]  ;;  %v265_v24 = vld [vmem:[%s3665_s28 + $0xa0] sm:$0xff] }
  0x63   : > { %2747 = vmatpush3.bf16.msra.mxu0 %v2746_v9  ;;  %v279_v21 = vld [vmem:[%s3665_s28 + $0x110] sm:$0xff]  ;;  %v2750_v22 = vpack.c.bf16 %v248_v20, %v247_v19  ;;  %v280_v23 = vld [vmem:[%s3665_s28 + $0x118] sm:$0xff]  ;;  %v266_v25 = vld [vmem:[%s3665_s28 + $0xa8] sm:$0xff]  ;;  %v3730_v14 = vsub.s32 %v768_v0, %v770_v1 }
  0x64   : > { %2779 = vmatpush3.bf16.msra.mxu1 %v2778_v13  ;;  %2749 = vmatprep.subr.bf16.mxu0 %v2748_v17  ;;  %v2782_v26 = vpack.c.bf16 %v280_v23, %v279_v21  ;;  %v2752_v27 = vpack.c.bf16 %v266_v25, %v265_v24  ;;  %v297_v28 = vld [vmem:[%s3665_s28 + $0x1a0] sm:$0xff]  ;;  %v298_v29 = vld [vmem:[%s3665_s28 + $0x1a8] sm:$0xff]  ;;  %v267_v36 = vld [vmem:[%s3665_s28 + $0xb0] sm:$0xff] }
  0x65   : > { %2781 = vmatprep.subr.bf16.mxu1 %v2780_v18  ;;  %v249_v30 = vld [vmem:[%s3665_s28 + $0x20] sm:$0xff]  ;;  %v2784_v31 = vpack.c.bf16 %v298_v29, %v297_v28  ;;  %v250_v32 = vld [vmem:[%s3665_s28 + $0x28] sm:$0xff]  ;;  %v268_v37 = vld [vmem:[%s3665_s28 + $0xb8] sm:$0xff] }
  0x66   : > { %v281_v33 = vld [vmem:[%s3665_s28 + $0x120] sm:$0xff]  ;;  %v282_v34 = vld [vmem:[%s3665_s28 + $0x128] sm:$0xff]  ;;  %v2754_v35 = vpack.c.bf16 %v250_v32, %v249_v30  ;;  %v299_v38 = vld [vmem:[%s3665_s28 + $0x1b0] sm:$0xff]  ;;  %v2756_v40 = vpack.c.bf16 %v268_v37, %v267_v36 }
  0x67   : > { %2751 = vmatpush3.bf16.msra.mxu0 %v2750_v22  ;;  %v2786_v39 = vpack.c.bf16 %v282_v34, %v281_v33  ;;  %v300_v41 = vld [vmem:[%s3665_s28 + $0x1b8] sm:$0xff]  ;;  %v251_v42 = vld [vmem:[%s3665_s28 + $0x30] sm:$0xff]  ;;  %v269_v47 = vld [vmem:[%s3665_s28 + $0xc0] sm:$0xff] }
  0x68   : > { %2783 = vmatpush3.bf16.msra.mxu1 %v2782_v26  ;;  %2753 = vmatprep.subr.bf16.mxu0 %v2752_v27  ;;  %v252_v43 = vld [vmem:[%s3665_s28 + $0x38] sm:$0xff]  ;;  %v2788_v44 = vpack.c.bf16 %v300_v41, %v299_v38  ;;  %v283_v45 = vld [vmem:[%s3665_s28 + $0x130] sm:$0xff]  ;;  %v270_v51 = vld [vmem:[%s3665_s28 + $0xc8] sm:$0xff] }
  0x69   : > { %2785 = vmatprep.subr.bf16.mxu1 %v2784_v31  ;;  %v284_v46 = vld [vmem:[%s3665_s28 + $0x138] sm:$0xff]  ;;  %v301_v52 = vld [vmem:[%s3665_s28 + $0x1c0] sm:$0xff]  ;;  %v302_v53 = vld [vmem:[%s3665_s28 + $0x1c8] sm:$0xff]  ;;  %v2758_v54 = vpack.c.bf16 %v252_v43, %v251_v42  ;;  %v2760_v56 = vpack.c.bf16 %v270_v51, %v269_v47 }
  0x6a   : > { %v2790_v55 = vpack.c.bf16 %v284_v46, %v283_v45  ;;  %v253_v57 = vld [vmem:[%s3665_s28 + $0x40] sm:$0xff]  ;;  %v254_v58 = vld [vmem:[%s3665_s28 + $0x48] sm:$0xff]  ;;  %v2792_v60 = vpack.c.bf16 %v302_v53, %v301_v52  ;;  %v271_v62 = vld [vmem:[%s3665_s28 + $0xd0] sm:$0xff] }
  0x6b   : > { %2755 = vmatpush3.bf16.msra.mxu0 %v2754_v35  ;;  %v285_v59 = vld [vmem:[%s3665_s28 + $0x140] sm:$0xff]  ;;  %v286_v61 = vld [vmem:[%s3665_s28 + $0x148] sm:$0xff]  ;;  %v272_v63 = vld [vmem:[%s3665_s28 + $0xd8] sm:$0xff]  ;;  %v2762_v4 = vpack.c.bf16 %v254_v58, %v253_v57 }
  0x6c   : > { %2787 = vmatpush3.bf16.msra.mxu1 %v2786_v39  ;;  %2757 = vmatprep.subr.bf16.mxu0 %v2756_v40  ;;  %v303_v2 = vld [vmem:[%s3665_s28 + $0x1d0] sm:$0xff]  ;;  %v304_v3 = vld [vmem:[%s3665_s28 + $0x1d8] sm:$0xff]  ;;  %v2794_v5 = vpack.c.bf16 %v286_v61, %v285_v59  ;;  %v2764_v6 = vpack.c.bf16 %v272_v63, %v271_v62  ;;  %v273_v12 = vld [vmem:[%s3665_s28 + $0xe0] sm:$0xff] }
  0x6d   : > { %2789 = vmatprep.subr.bf16.mxu1 %v2788_v44  ;;  %v255_v7 = vld [vmem:[%s3665_s28 + $0x50] sm:$0xff]  ;;  %v256_v8 = vld [vmem:[%s3665_s28 + $0x58] sm:$0xff]  ;;  %v2796_v10 = vpack.c.bf16 %v304_v3, %v303_v2  ;;  %v274_v13 = vld [vmem:[%s3665_s28 + $0xe8] sm:$0xff] }
  0x6e   : > { %v287_v9 = vld [vmem:[%s3665_s28 + $0x150] sm:$0xff]  ;;  %v288_v11 = vld [vmem:[%s3665_s28 + $0x158] sm:$0xff]  ;;  %v305_v15 = vld [vmem:[%s3665_s28 + $0x1e0] sm:$0xff]  ;;  %v2766_v17 = vpack.c.bf16 %v256_v8, %v255_v7  ;;  %v2768_v20 = vpack.c.bf16 %v274_v13, %v273_v12 }
  0x6f   : > { %2759 = vmatpush3.bf16.msra.mxu0 %v2758_v54  ;;  %v306_v16 = vld [vmem:[%s3665_s28 + $0x1e8] sm:$0xff]  ;;  %v257_v18 = vld [vmem:[%s3665_s28 + $0x60] sm:$0xff]  ;;  %v2798_v19 = vpack.c.bf16 %v288_v11, %v287_v9  ;;  %v275_v26 = vld [vmem:[%s3665_s28 + $0xf0] sm:$0xff] }
  0x70   : > { %2791 = vmatpush3.bf16.msra.mxu1 %v2790_v55  ;;  %2761 = vmatprep.subr.bf16.mxu0 %v2760_v56  ;;  %v258_v21 = vld [vmem:[%s3665_s28 + $0x68] sm:$0xff]  ;;  %v289_v22 = vld [vmem:[%s3665_s28 + $0x160] sm:$0xff]  ;;  %v2800_v24 = vpack.c.bf16 %v306_v16, %v305_v15  ;;  %v276_v27 = vld [vmem:[%s3665_s28 + $0xf8] sm:$0xff] }
  0x71   : > { %2793 = vmatprep.subr.bf16.mxu1 %v2792_v60  ;;  %v237_v23 = vld [vmem:[%s3659_s4] sm:$0xff]  ;;  %v290_v25 = vld [vmem:[%s3665_s28 + $0x168] sm:$0xff]  ;;  %v307_v30 = vld [vmem:[%s3665_s28 + $0x1f0] sm:$0xff]  ;;  %v2770_v32 = vpack.c.bf16 %v258_v21, %v257_v18  ;;  %v2772_v36 = vpack.c.bf16 %v276_v27, %v275_v26 }
  0x72   : > { %v772_v28 = vrot.slane %v237_v23, %v3730_v14  ;;  %v765_v29 = vcombine.high %v237_v23, %v237_v23  ;;  %v308_v31 = vld [vmem:[%s3665_s28 + $0x1f8] sm:$0xff]  ;;  %v2802_v35 = vpack.c.bf16 %v290_v25, %v289_v22  ;;  %v259_v37 = vld [vmem:[%s3665_s28 + $0x70] sm:$0xff]  ;;  %v325_v43 = vld [vmem:[%s3665_s28 + $0x280] sm:$0xff] }
  0x73   : > { %2763 = vmatpush3.bf16.msra.mxu0 %v2762_v4  ;;  %v260_v38 = vld [vmem:[%s3665_s28 + $0x78] sm:$0xff]  ;;  %v291_v39 = vld [vmem:[%s3665_s28 + $0x170] sm:$0xff]  ;;  %v2804_v40 = vpack.c.bf16 %v308_v31, %v307_v30  ;;  %v326_v44 = vld [vmem:[%s3665_s28 + $0x288] sm:$0xff] }
  0x74   : > { %2795 = vmatpush3.bf16.msra.mxu1 %v2794_v5  ;;  %2765 = vmatprep.subr.bf16.mxu0 %v2764_v6  ;;  %v780_v33 = vcombine.high %v772_v28, %v772_v28  ;;  %v779_v34 = vrot.slane %v765_v29, %v3730_v14  ;;  %v292_v41 = vld [vmem:[%s3665_s28 + $0x178] sm:$0xff]  ;;  %v357_v45 = vld [vmem:[%s3665_s28 + $0x380] sm:$0xff]  ;;  %v358_v46 = vld [vmem:[%s3665_s28 + $0x388] sm:$0xff]  ;;  %v2774_v47 = vpack.c.bf16 %v260_v38, %v259_v37 }
  0x75   : > { %2797 = vmatprep.subr.bf16.mxu1 %v2796_v10  ;;  %v2806_v48 = vpack.c.bf16 %v292_v41, %v291_v39  ;;  %v2808_v49 = vpack.c.bf16 %v326_v44, %v325_v43  ;;  %v309_v50 = vld [vmem:[%s3665_s28 + $0x200] sm:$0xff]  ;;  %v310_v51 = vld [vmem:[%s3665_s28 + $0x208] sm:$0xff]  ;;  %v2840_v53 = vpack.c.bf16 %v358_v46, %v357_v45  ;;  %v327_v55 = vld [vmem:[%s3665_s28 + $0x290] sm:$0xff] }
  0x76   : > { %997 = vmatprep.mubr.f32.mxu0 %v780_v33  ;;  %v781_v42 = vcombine.high %v779_v34, %v779_v34  ;;  %v341_v52 = vld [vmem:[%s3665_s28 + $0x300] sm:$0xff]  ;;  %v342_v54 = vld [vmem:[%s3665_s28 + $0x308] sm:$0xff]  ;;  %v328_v56 = vld [vmem:[%s3665_s28 + $0x298] sm:$0xff]  ;;  %v2810_v59 = vpack.c.bf16 %v310_v51, %v309_v50 }
  0x77   : > { %2767 = vmatpush3.bf16.msra.mxu0 %v2766_v17  ;;  %v359_v57 = vld [vmem:[%s3665_s28 + $0x390] sm:$0xff]  ;;  %v360_v58 = vld [vmem:[%s3665_s28 + $0x398] sm:$0xff]  ;;  %v2842_v60 = vpack.c.bf16 %v342_v54, %v341_v52  ;;  %v2812_v61 = vpack.c.bf16 %v328_v56, %v327_v55  ;;  %v329_v3 = vld [vmem:[%s3665_s28 + $0x2a0] sm:$0xff] }
  0x78   : > { %2799 = vmatpush3.bf16.msra.mxu1 %v2798_v19  ;;  %2769 = vmatprep.subr.bf16.mxu0 %v2768_v20  ;;  %v311_v62 = vld [vmem:[%s3665_s28 + $0x210] sm:$0xff]  ;;  %v312_v63 = vld [vmem:[%s3665_s28 + $0x218] sm:$0xff]  ;;  %v2844_v1 = vpack.c.bf16 %v360_v58, %v359_v57  ;;  %v330_v4 = vld [vmem:[%s3665_s28 + $0x2a8] sm:$0xff] }
  0x79   : > { %2801 = vmatprep.subr.bf16.mxu1 %v2800_v24  ;;  %1067 = vmatprep.mubr.f32.mxu1 %v781_v42  ;;  %v343_v0 = vld [vmem:[%s3665_s28 + $0x310] sm:$0xff]  ;;  %v344_v2 = vld [vmem:[%s3665_s28 + $0x318] sm:$0xff]  ;;  %v361_v5 = vld [vmem:[%s3665_s28 + $0x3a0] sm:$0xff]  ;;  %v2814_v7 = vpack.c.bf16 %v312_v63, %v311_v62  ;;  %v2816_v9 = vpack.c.bf16 %v330_v4, %v329_v3 }
  0x7a   : > { %v362_v6 = vld [vmem:[%s3665_s28 + $0x3a8] sm:$0xff]  ;;  %v2846_v8 = vpack.c.bf16 %v344_v2, %v343_v0  ;;  %v313_v10 = vld [vmem:[%s3665_s28 + $0x220] sm:$0xff]  ;;  %v331_v16 = vld [vmem:[%s3665_s28 + $0x2b0] sm:$0xff] }
  0x7b   : > { %2771 = vmatpush3.bf16.msra.mxu0 %v2770_v32  ;;  %v314_v11 = vld [vmem:[%s3665_s28 + $0x228] sm:$0xff]  ;;  %v345_v12 = vld [vmem:[%s3665_s28 + $0x320] sm:$0xff]  ;;  %v2848_v13 = vpack.c.bf16 %v362_v6, %v361_v5  ;;  %v332_v17 = vld [vmem:[%s3665_s28 + $0x2b8] sm:$0xff] }
  0x7c   : > { %2803 = vmatpush3.bf16.msra.mxu1 %v2802_v35  ;;  %2773 = vmatprep.subr.bf16.mxu0 %v2772_v36  ;;  %v346_v15 = vld [vmem:[%s3665_s28 + $0x328] sm:$0xff]  ;;  %v363_v18 = vld [vmem:[%s3665_s28 + $0x3b0] sm:$0xff]  ;;  %v364_v19 = vld [vmem:[%s3665_s28 + $0x3b8] sm:$0xff]  ;;  %v2818_v20 = vpack.c.bf16 %v314_v11, %v313_v10  ;;  %v2820_v22 = vpack.c.bf16 %v332_v17, %v331_v16 }
  0x7d   : > { %2805 = vmatprep.subr.bf16.mxu1 %v2804_v40  ;;  %v2850_v21 = vpack.c.bf16 %v346_v15, %v345_v12  ;;  %v315_v23 = vld [vmem:[%s3665_s28 + $0x230] sm:$0xff]  ;;  %v316_v24 = vld [vmem:[%s3665_s28 + $0x238] sm:$0xff]  ;;  %v2852_v26 = vpack.c.bf16 %v364_v19, %v363_v18  ;;  %v334_v29 = vld [vmem:[%s3665_s28 + $0x2c8] sm:$0xff] }
  0x7e   : > { %v347_v25 = vld [vmem:[%s3665_s28 + $0x330] sm:$0xff]  ;;  %v348_v27 = vld [vmem:[%s3665_s28 + $0x338] sm:$0xff]  ;;  %v365_v30 = vld [vmem:[%s3665_s28 + $0x3c0] sm:$0xff]  ;;  %v2822_v33 = vpack.c.bf16 %v316_v24, %v315_v23 }
  0x7f   : > { %2775 = vmatpush3.bf16.msra.mxu0 %v2774_v47  ;;  %v366_v31 = vld [vmem:[%s3665_s28 + $0x3c8] sm:$0xff]  ;;  %v2854_v36 = vpack.c.bf16 %v348_v27, %v347_v25  ;;  %v317_v38 = vld [vmem:[%s3665_s28 + $0x240] sm:$0xff]  ;;  %v335_v43 = vld [vmem:[%s3665_s28 + $0x2d0] sm:$0xff] }
  0x80   : > { %2807 = vmatpush3.bf16.msra.mxu1 %v2806_v48  ;;  %2809 = vmatprep.subr.bf16.mxu0 %v2808_v49  ;;  %v238_v32 = vld [vmem:[%s3659_s4 + $0x8] sm:$0xff]  ;;  %v349_v40 = vld [vmem:[%s3665_s28 + $0x340] sm:$0xff]  ;;  %v2856_v41 = vpack.c.bf16 %v366_v31, %v365_v30  ;;  %v336_v44 = vld [vmem:[%s3665_s28 + $0x2d8] sm:$0xff] }
  0x81   : > { %2841 = vmatprep.subr.bf16.mxu1 %v2840_v53  ;;  %v782_v35 = vcombine.high %v238_v32, %v238_v32  ;;  %v318_v39 = vld [vmem:[%s3665_s28 + $0x248] sm:$0xff]  ;;  %v367_v47 = vld [vmem:[%s3665_s28 + $0x3d0] sm:$0xff]  ;;  %v368_v48 = vld [vmem:[%s3665_s28 + $0x3d8] sm:$0xff]  ;;  %v2828_v52 = vpack.c.bf16 %v336_v44, %v335_v43 }
  0x82   : > { %998 = vmatmul.mubr.f32.vlgmr.msra.gmra.mrb[0].mxu0 %v772_v28  ;;  %v333_v28 = vld [vmem:[%s3665_s28 + $0x2c0] sm:$0xff]  ;;  %v350_v42 = vld [vmem:[%s3665_s28 + $0x348] sm:$0xff]  ;;  %v2826_v49 = vpack.c.bf16 %v318_v39, %v317_v38  ;;  %v319_v53 = vld [vmem:[%s3665_s28 + $0x250] sm:$0xff]  ;;  %v2860_v56 = vpack.c.bf16 %v368_v48, %v367_v47 }
  0x83   : > { %1068 = vmatmul.mubr.f32.vlgmr.msra.gmra.mrb[0].mxu1 %v779_v34  ;;  %2811 = vmatpush3.bf16.msra.mxu0 %v2810_v59  ;;  %v3787_v34 = vrot.slane %v238_v32, %v3730_v14  ;;  %v2824_v37 = vpack.c.bf16 %v334_v29, %v333_v28  ;;  %v3798_v46 = vrot.slane %v782_v35, %v3730_v14  ;;  %v320_v54 = vld [vmem:[%s3665_s28 + $0x258] sm:$0xff]  ;;  %v351_v55 = vld [vmem:[%s3665_s28 + $0x350] sm:$0xff]  ;;  %v337_v58 = vld [vmem:[%s3665_s28 + $0x2e0] sm:$0xff] }
  0x84   : > { %2843 = vmatpush3.bf16.msra.mxu1 %v2842_v60  ;;  %2813 = vmatprep.subr.bf16.mxu0 %v2812_v61  ;;  %v2858_v51 = vpack.c.bf16 %v350_v42, %v349_v40  ;;  %v352_v57 = vld [vmem:[%s3665_s28 + $0x358] sm:$0xff]  ;;  %v338_v59 = vld [vmem:[%s3665_s28 + $0x2e8] sm:$0xff]  ;;  %v369_v60 = vld [vmem:[%s3665_s28 + $0x3e0] sm:$0xff]  ;;  %v2830_v62 = vpack.c.bf16 %v320_v54, %v319_v53 }
  0x85   : > { %2845 = vmatprep.subr.bf16.mxu1 %v2844_v1  ;;  %v797_v45 = vcombine.high %v3787_v34, %v3787_v34  ;;  %v798_v50 = vcombine.high %v3798_v46, %v3798_v46  ;;  %v370_v61 = vld [vmem:[%s3665_s28 + $0x3e8] sm:$0xff]  ;;  %v2862_v63 = vpack.c.bf16 %v352_v57, %v351_v55  ;;  %v2832_v0 = vpack.c.bf16 %v338_v59, %v337_v58  ;;  %v321_v1 = vld [vmem:[%s3665_s28 + $0x260] sm:$0xff]  ;;  %v339_v6 = vld [vmem:[%s3665_s28 + $0x2f0] sm:$0xff] }
  0x86   : > { %v322_v2 = vld [vmem:[%s3665_s28 + $0x268] sm:$0xff]  ;;  %v353_v3 = vld [vmem:[%s3665_s28 + $0x360] sm:$0xff]  ;;  %v2864_v4 = vpack.c.bf16 %v370_v61, %v369_v60  ;;  %v324_v15 = vld [vmem:[%s3665_s28 + $0x278] sm:$0xff] }
  0x87   : > { %2815 = vmatpush3.bf16.msra.mxu0 %v2814_v7  ;;  %1137 = vmatprep.mubr.f32.mxu0 %v797_v45  ;;  %v354_v5 = vld [vmem:[%s3665_s28 + $0x368] sm:$0xff]  ;;  %v340_v7 = vld [vmem:[%s3665_s28 + $0x2f8] sm:$0xff]  ;;  %v2834_v10 = vpack.c.bf16 %v322_v2, %v321_v1  ;;  %v355_v16 = vld [vmem:[%s3665_s28 + $0x370] sm:$0xff] }
  0x88   : > { %2847 = vmatpush3.bf16.msra.mxu1 %v2846_v8  ;;  %2817 = vmatprep.subr.bf16.mxu0 %v2816_v9  ;;  %v371_v8 = vld [vmem:[%s3665_s28 + $0x3f0] sm:$0xff]  ;;  %v372_v9 = vld [vmem:[%s3665_s28 + $0x3f8] sm:$0xff]  ;;  %v2866_v11 = vpack.c.bf16 %v354_v5, %v353_v3  ;;  %v2836_v12 = vpack.c.bf16 %v340_v7, %v339_v6  ;;  %v389_v19 = vld [vmem:[%s3665_s28 + $0x480] sm:$0xff] }
  0x89   : > { %2849 = vmatprep.subr.bf16.mxu1 %v2848_v13  ;;  %1207 = vmatprep.mubr.f32.mxu1 %v798_v50  ;;  %v323_v13 = vld [vmem:[%s3665_s28 + $0x270] sm:$0xff]  ;;  %v2868_v17 = vpack.c.bf16 %v372_v9, %v371_v8  ;;  %v356_v18 = vld [vmem:[%s3665_s28 + $0x378] sm:$0xff]  ;;  %v373_v24 = vld [vmem:[%s3665_s28 + $0x400] sm:$0xff] }
  0x8a   : > { %v2838_v23 = vpack.c.bf16 %v324_v15, %v323_v13  ;;  %v2870_v25 = vpack.c.bf16 %v356_v18, %v355_v16  ;;  %v374_v27 = vld [vmem:[%s3665_s28 + $0x408] sm:$0xff]  ;;  %v405_v28 = vld [vmem:[%s3665_s28 + $0x500] sm:$0xff]  ;;  %v391_v31 = vld [vmem:[%s3665_s28 + $0x490] sm:$0xff] }
  0x8b   : > { %2819 = vmatpush3.bf16.msra.mxu0 %v2818_v20  ;;  %v390_v20 = vld [vmem:[%s3665_s28 + $0x488] sm:$0xff]  ;;  %v392_v32 = vld [vmem:[%s3665_s28 + $0x498] sm:$0xff]  ;;  %v239_v38 = vld [vmem:[%s3659_s4 + $0x10] sm:$0xff] }
  0x8c   : > { %2851 = vmatpush3.bf16.msra.mxu1 %v2850_v21  ;;  %2821 = vmatprep.subr.bf16.mxu0 %v2820_v22  ;;  %v421_v21 = vld [vmem:[%s3665_s28 + $0x580] sm:$0xff]  ;;  %v422_v22 = vld [vmem:[%s3665_s28 + $0x588] sm:$0xff]  ;;  %v424_v35 = vld [vmem:[%s3665_s28 + $0x598] sm:$0xff]  ;;  %v2876_v39 = vpack.c.bf16 %v392_v32, %v391_v31  ;;  %v3841_v43 = vrot.slane %v239_v38, %v3730_v14  ;;  %v799_v44 = vcombine.high %v239_v38, %v239_v38 }
  0x8d   : > { %2853 = vmatprep.subr.bf16.mxu1 %v2852_v26  ;;  %v2872_v26 = vpack.c.bf16 %v390_v20, %v389_v19  ;;  %v406_v29 = vld [vmem:[%s3665_s28 + $0x508] sm:$0xff]  ;;  %v2904_v30 = vpack.c.bf16 %v422_v22, %v421_v21  ;;  %v375_v40 = vld [vmem:[%s3665_s28 + $0x410] sm:$0xff]  ;;  %v408_v47 = vld [vmem:[%s3665_s28 + $0x518] sm:$0xff] }
  0x8e   : > { %v407_v42 = vld [vmem:[%s3665_s28 + $0x510] sm:$0xff]  ;;  %v393_v48 = vld [vmem:[%s3665_s28 + $0x4a0] sm:$0xff]  ;;  %v3852_v53 = vrot.slane %v799_v44, %v3730_v14  ;;  %v378_v57 = vld [vmem:[%s3665_s28 + $0x428] sm:$0xff] }
  0x8f   : > { %2823 = vmatpush3.bf16.msra.mxu0 %v2822_v33  ;;  %v423_v33 = vld [vmem:[%s3665_s28 + $0x590] sm:$0xff]  ;;  %v425_v50 = vld [vmem:[%s3665_s28 + $0x5a0] sm:$0xff]  ;;  %v410_v61 = vld [vmem:[%s3665_s28 + $0x528] sm:$0xff] }
  0x90   : > { %2855 = vmatpush3.bf16.msra.mxu1 %v2854_v36  ;;  %2825 = vmatprep.subr.bf16.mxu0 %v2824_v37  ;;  %v2874_v36 = vpack.c.bf16 %v374_v27, %v373_v24  ;;  %v2906_v37 = vpack.c.bf16 %v406_v29, %v405_v28  ;;  %v2908_v45 = vpack.c.bf16 %v424_v35, %v423_v33  ;;  %v409_v58 = vld [vmem:[%s3665_s28 + $0x520] sm:$0xff]  ;;  %v380_v5 = vld [vmem:[%s3665_s28 + $0x438] sm:$0xff]  ;;  %v411_v6 = vld [vmem:[%s3665_s28 + $0x530] sm:$0xff] }
  0x91   : > { %2857 = vmatprep.subr.bf16.mxu1 %v2856_v41  ;;  %v376_v41 = vld [vmem:[%s3665_s28 + $0x418] sm:$0xff]  ;;  %v815_v59 = vcombine.high %v3852_v53, %v3852_v53  ;;  %v2914_v2 = vpack.c.bf16 %v410_v61, %v409_v58  ;;  %v397_v9 = vld [vmem:[%s3665_s28 + $0x4c0] sm:$0xff]  ;;  %v382_v18 = vld [vmem:[%s3665_s28 + $0x448] sm:$0xff] }
  0x92   : > { %v2878_v54 = vpack.c.bf16 %v376_v41, %v375_v40  ;;  %v412_v8 = vld [vmem:[%s3665_s28 + $0x538] sm:$0xff]  ;;  %v413_v19 = vld [vmem:[%s3665_s28 + $0x540] sm:$0xff]  ;;  %v414_v21 = vld [vmem:[%s3665_s28 + $0x548] sm:$0xff] }
  0x93   : > { %2827 = vmatpush3.bf16.msra.mxu0 %v2826_v49  ;;  %v394_v49 = vld [vmem:[%s3665_s28 + $0x4a8] sm:$0xff]  ;;  %v2918_v15 = vpack.c.bf16 %v412_v8, %v411_v6  ;;  %v399_v22 = vld [vmem:[%s3665_s28 + $0x4d0] sm:$0xff]  ;;  %v2922_v27 = vpack.c.bf16 %v414_v21, %v413_v19  ;;  %v416_v33 = vld [vmem:[%s3665_s28 + $0x558] sm:$0xff] }
  0x94   : > { %2859 = vmatpush3.bf16.msra.mxu1 %v2858_v51  ;;  %2829 = vmatprep.subr.bf16.mxu0 %v2828_v52  ;;  %v426_v51 = vld [vmem:[%s3665_s28 + $0x5a8] sm:$0xff]  ;;  %v814_v52 = vcombine.high %v3841_v43, %v3841_v43  ;;  %v2880_v55 = vpack.c.bf16 %v394_v49, %v393_v48  ;;  %v431_v24 = vld [vmem:[%s3665_s28 + $0x5d0] sm:$0xff]  ;;  %v401_v35 = vld [vmem:[%s3665_s28 + $0x4e0] sm:$0xff] }
  0x95   : > { %2861 = vmatprep.subr.bf16.mxu1 %v2860_v56  ;;  %v377_v56 = vld [vmem:[%s3665_s28 + $0x420] sm:$0xff]  ;;  %v2912_v60 = vpack.c.bf16 %v426_v51, %v425_v50  ;;  %v383_v29 = vld [vmem:[%s3665_s28 + $0x450] sm:$0xff]  ;;  %v434_v38 = vld [vmem:[%s3665_s28 + $0x5e8] sm:$0xff] }
  0x96   : > { %v2882_v1 = vpack.c.bf16 %v378_v57, %v377_v56  ;;  %v415_v31 = vld [vmem:[%s3665_s28 + $0x550] sm:$0xff]  ;;  %v386_v44 = vld [vmem:[%s3665_s28 + $0x468] sm:$0xff]  ;;  %v404_v50 = vld [vmem:[%s3665_s28 + $0x4f8] sm:$0xff] }
  0x97   : > { %2831 = vmatpush3.bf16.msra.mxu0 %v2830_v62  ;;  %v396_v62 = vld [vmem:[%s3665_s28 + $0x4b8] sm:$0xff]  ;;  %v2926_v40 = vpack.c.bf16 %v416_v33, %v415_v31  ;;  %v418_v48 = vld [vmem:[%s3665_s28 + $0x568] sm:$0xff]  ;;  %v403_v49 = vld [vmem:[%s3665_s28 + $0x4f0] sm:$0xff] }
  0x98   : > { %2863 = vmatpush3.bf16.msra.mxu1 %v2862_v63  ;;  %2833 = vmatprep.subr.bf16.mxu0 %v2832_v0  ;;  %v427_v63 = vld [vmem:[%s3665_s28 + $0x5b0] sm:$0xff]  ;;  %v428_v0 = vld [vmem:[%s3665_s28 + $0x5b8] sm:$0xff]  ;;  %v2900_v56 = vpack.c.bf16 %v404_v50, %v403_v49  ;;  %v438_v6 = vld [vmem:[%s3665_s28 + $0x608] sm:$0xff] }
  0x99   : > { %2865 = vmatprep.subr.bf16.mxu1 %v2864_v4  ;;  %v379_v4 = vld [vmem:[%s3665_s28 + $0x430] sm:$0xff]  ;;  %v2916_v7 = vpack.c.bf16 %v428_v0, %v427_v63  ;;  %v388_v58 = vld [vmem:[%s3665_s28 + $0x478] sm:$0xff]  ;;  %v485_v63 = vld [vmem:[%s3665_s28 + $0x780] sm:$0xff] }
  0x9a   : > { %v2886_v13 = vpack.c.bf16 %v380_v5, %v379_v4  ;;  %v435_v51 = vld [vmem:[%s3665_s28 + $0x5f0] sm:$0xff]  ;;  %v420_v61 = vld [vmem:[%s3665_s28 + $0x578] sm:$0xff]  ;;  %v486_v0 = vld [vmem:[%s3665_s28 + $0x788] sm:$0xff] }
  0x9b   : > { %2835 = vmatpush3.bf16.msra.mxu0 %v2834_v10  ;;  %v398_v10 = vld [vmem:[%s3665_s28 + $0x4c8] sm:$0xff]  ;;  %v387_v57 = vld [vmem:[%s3665_s28 + $0x470] sm:$0xff]  ;;  %v437_v5 = vld [vmem:[%s3665_s28 + $0x600] sm:$0xff]  ;;  %v2968_v8 = vpack.c.bf16 %v486_v0, %v485_v63 }
  0x9c   : > { %2867 = vmatpush3.bf16.msra.mxu1 %v2866_v11  ;;  %2837 = vmatprep.subr.bf16.mxu0 %v2836_v12  ;;  %v429_v11 = vld [vmem:[%s3665_s28 + $0x5c0] sm:$0xff]  ;;  %v430_v12 = vld [vmem:[%s3665_s28 + $0x5c8] sm:$0xff]  ;;  %v2888_v16 = vpack.c.bf16 %v398_v10, %v397_v9  ;;  %v455_v10 = vld [vmem:[%s3665_s28 + $0x690] sm:$0xff] }
  0x9d   : > { %2869 = vmatprep.subr.bf16.mxu1 %v2868_v17  ;;  %v381_v17 = vld [vmem:[%s3665_s28 + $0x440] sm:$0xff]  ;;  %v2920_v20 = vpack.c.bf16 %v430_v12, %v429_v11  ;;  %v470_v9 = vld [vmem:[%s3665_s28 + $0x708] sm:$0xff]  ;;  %v456_v11 = vld [vmem:[%s3665_s28 + $0x698] sm:$0xff] }
  0x9e   : > { %v2940_v19 = vpack.c.bf16 %v456_v11, %v455_v10  ;;  %v440_v21 = vld [vmem:[%s3665_s28 + $0x618] sm:$0xff]  ;;  %v475_v49 = vld [vmem:[%s3665_s28 + $0x730] sm:$0xff]  ;;  %v465_v11 = vld [vmem:[%s3665_s28 + $0x6e0] sm:$0xff] }
  0x9f   : > { %2839 = vmatpush3.bf16.msra.mxu0 %v2838_v23  ;;  %v400_v23 = vld [vmem:[%s3665_s28 + $0x4d8] sm:$0xff]  ;;  %v463_v63 = vld [vmem:[%s3665_s28 + $0x6d0] sm:$0xff] }
  0xa0   : > { %2871 = vmatpush3.bf16.msra.mxu1 %v2870_v25  ;;  %2873 = vmatprep.subr.bf16.mxu0 %v2872_v26  ;;  %v432_v25 = vld [vmem:[%s3665_s28 + $0x5d8] sm:$0xff]  ;;  %v2890_v26 = vpack.c.bf16 %v382_v18, %v381_v17  ;;  %v2892_v28 = vpack.c.bf16 %v400_v23, %v399_v22  ;;  %v2938_v17 = vpack.c.bf16 %v438_v6, %v437_v5  ;;  %v471_v22 = vld [vmem:[%s3665_s28 + $0x710] sm:$0xff] }
  0xa1   : > { %2905 = vmatprep.subr.bf16.mxu1 %v2904_v30  ;;  %v384_v30 = vld [vmem:[%s3665_s28 + $0x458] sm:$0xff]  ;;  %v2924_v32 = vpack.c.bf16 %v432_v25, %v431_v24  ;;  %v457_v25 = vld [vmem:[%s3665_s28 + $0x6a0] sm:$0xff]  ;;  %v447_v6 = vld [vmem:[%s3665_s28 + $0x650] sm:$0xff] }
  0xa2   : > { %1138 = vmatmul.mubr.f32.vlgmr.msra.gmra.mrb[2].mxu0 %v3787_v34  ;;  %v2910_v34 = vpack.c.bf16 %v408_v47, %v407_v42  ;;  %v385_v42 = vld [vmem:[%s3665_s28 + $0x460] sm:$0xff]  ;;  %v472_v24 = vld [vmem:[%s3665_s28 + $0x718] sm:$0xff] }
  0xa3   : > { %2875 = vmatpush3.bf16.msra.mxu0 %v2874_v36  ;;  %1208 = vmatmul.mubr.f32.vlgmr.msra.gmra.mrb[2].mxu1 %v3798_v46  ;;  %v395_v46 = vld [vmem:[%s3665_s28 + $0x4b0] sm:$0xff]  ;;  %v402_v36 = vld [vmem:[%s3665_s28 + $0x4e8] sm:$0xff]  ;;  %v464_v0 = vld [vmem:[%s3665_s28 + $0x6d8] sm:$0xff] }
  0xa4   : > { %2907 = vmatpush3.bf16.msra.mxu1 %v2906_v37  ;;  %2877 = vmatprep.subr.bf16.mxu0 %v2876_v39  ;;  %v2884_v3 = vpack.c.bf16 %v396_v62, %v395_v46  ;;  %v433_v37 = vld [vmem:[%s3665_s28 + $0x5e0] sm:$0xff]  ;;  %v2894_v39 = vpack.c.bf16 %v384_v30, %v383_v29  ;;  %v2896_v41 = vpack.c.bf16 %v402_v36, %v401_v35  ;;  %v454_v62 = vld [vmem:[%s3665_s28 + $0x688] sm:$0xff]  ;;  %v480_v10 = vld [vmem:[%s3665_s28 + $0x758] sm:$0xff] }
  0xa5   : > { %2909 = vmatprep.subr.bf16.mxu1 %v2908_v45  ;;  %1277 = vmatprep.mubr.f32.mxu0 %v814_v52  ;;  %v417_v45 = vld [vmem:[%s3665_s28 + $0x560] sm:$0xff]  ;;  %v2928_v47 = vpack.c.bf16 %v434_v38, %v433_v37  ;;  %v436_v52 = vld [vmem:[%s3665_s28 + $0x5f8] sm:$0xff]  ;;  %v490_v29 = vld [vmem:[%s3665_s28 + $0x7a8] sm:$0xff]  ;;  %v2956_v5 = vpack.c.bf16 %v464_v0, %v463_v63 }
  0xa6   : > { %1347 = vmatprep.mubr.f32.mxu1 %v815_v59  ;;  %v419_v59 = vld [vmem:[%s3665_s28 + $0x570] sm:$0xff]  ;;  %v453_v46 = vld [vmem:[%s3665_s28 + $0x680] sm:$0xff]  ;;  %v474_v38 = vld [vmem:[%s3665_s28 + $0x728] sm:$0xff] }
  0xa7   : > { %2879 = vmatpush3.bf16.msra.mxu0 %v2878_v54  ;;  %v2898_v54 = vpack.c.bf16 %v386_v44, %v385_v42  ;;  %v2936_v4 = vpack.c.bf16 %v454_v62, %v453_v46  ;;  %v441_v35 = vld [vmem:[%s3665_s28 + $0x620] sm:$0xff]  ;;  %v478_v62 = vld [vmem:[%s3665_s28 + $0x748] sm:$0xff]  ;;  %v535_v63 = vld [vmem:[%s3665_s28 + $0x910] sm:$0xff] }
  0xa8   : > { %2911 = vmatpush3.bf16.msra.mxu1 %v2910_v34  ;;  %2881 = vmatprep.subr.bf16.mxu0 %v2880_v55  ;;  %v240_v34 = vld [vmem:[%s3659_s4 + $0x18] sm:$0xff]  ;;  %v2930_v55 = vpack.c.bf16 %v418_v48, %v417_v45  ;;  %v473_v36 = vld [vmem:[%s3665_s28 + $0x720] sm:$0xff] }
  0xa9   : > { %2913 = vmatprep.subr.bf16.mxu1 %v2912_v60  ;;  %v2932_v60 = vpack.c.bf16 %v436_v52, %v435_v51  ;;  %v3913_v12 = vrot.slane %v240_v34, %v3730_v14  ;;  %v2978_v44 = vpack.c.bf16 %v474_v38, %v473_v36  ;;  %v444_v48 = vld [vmem:[%s3665_s28 + $0x638] sm:$0xff]  ;;  %v461_v52 = vld [vmem:[%s3665_s28 + $0x6c0] sm:$0xff]  ;;  %v483_v36 = vld [vmem:[%s3665_s28 + $0x770] sm:$0xff] }
  0xaa   : > { %v476_v51 = vld [vmem:[%s3665_s28 + $0x738] sm:$0xff] }
  0xab   : > { %2883 = vmatpush3.bf16.msra.mxu0 %v2882_v1  ;;  %v816_v1 = vcombine.high %v240_v34, %v240_v34  ;;  %v493_v34 = vld [vmem:[%s3665_s28 + $0x7c0] sm:$0xff]  ;;  %v484_v38 = vld [vmem:[%s3665_s28 + $0x778] sm:$0xff] }
  0xac   : > { %2915 = vmatpush3.bf16.msra.mxu1 %v2914_v2  ;;  %2885 = vmatprep.subr.bf16.mxu0 %v2884_v3  ;;  %v2902_v2 = vpack.c.bf16 %v388_v58, %v387_v57  ;;  %v2934_v3 = vpack.c.bf16 %v420_v61, %v419_v59  ;;  %v2982_v57 = vpack.c.bf16 %v476_v51, %v475_v49  ;;  %v445_v59 = vld [vmem:[%s3665_s28 + $0x640] sm:$0xff]  ;;  %v502_v49 = vld [vmem:[%s3665_s28 + $0x808] sm:$0xff] }
  0xad   : > { %2917 = vmatprep.subr.bf16.mxu1 %v2916_v7  ;;  %v469_v7 = vld [vmem:[%s3665_s28 + $0x700] sm:$0xff] }
  0xae   : > { %v2970_v18 = vpack.c.bf16 %v470_v9, %v469_v7  ;;  %v477_v61 = vld [vmem:[%s3665_s28 + $0x740] sm:$0xff]  ;;  %v448_v7 = vld [vmem:[%s3665_s28 + $0x658] sm:$0xff] }
  0xaf   : > { %2887 = vmatpush3.bf16.msra.mxu0 %v2886_v13  ;;  %v487_v13 = vld [vmem:[%s3665_s28 + $0x790] sm:$0xff] }
  0xb0   : > { %2919 = vmatpush3.bf16.msra.mxu1 %v2918_v15  ;;  %2889 = vmatprep.subr.bf16.mxu0 %v2888_v16  ;;  %v488_v15 = vld [vmem:[%s3665_s28 + $0x798] sm:$0xff]  ;;  %v3918_v16 = vrot.slane %v816_v1, %v3730_v14  ;;  %v495_v1 = vld [vmem:[%s3665_s28 + $0x7d0] sm:$0xff] }
  0xb1   : > { %2921 = vmatprep.subr.bf16.mxu1 %v2920_v20  ;;  %v439_v20 = vld [vmem:[%s3665_s28 + $0x610] sm:$0xff]  ;;  %v2972_v23 = vpack.c.bf16 %v488_v15, %v487_v13  ;;  %v466_v13 = vld [vmem:[%s3665_s28 + $0x6e8] sm:$0xff]  ;;  %v497_v15 = vld [vmem:[%s3665_s28 + $0x7e0] sm:$0xff] }
  0xb2   : > { %v832_v30 = vcombine.high %v3918_v16, %v3918_v16  ;;  %v2942_v31 = vpack.c.bf16 %v440_v21, %v439_v20  ;;  %v2960_v20 = vpack.c.bf16 %v466_v13, %v465_v11  ;;  %v449_v21 = vld [vmem:[%s3665_s28 + $0x660] sm:$0xff] }
  0xb3   : > { %2891 = vmatpush3.bf16.msra.mxu0 %v2890_v26  ;;  %v458_v26 = vld [vmem:[%s3665_s28 + $0x6a8] sm:$0xff]  ;;  %v505_v11 = vld [vmem:[%s3665_s28 + $0x820] sm:$0xff] }
  0xb4   : > { %2923 = vmatpush3.bf16.msra.mxu1 %v2922_v27  ;;  %2893 = vmatprep.subr.bf16.mxu0 %v2892_v28  ;;  %v831_v27 = vcombine.high %v3913_v12, %v3913_v12  ;;  %v489_v28 = vld [vmem:[%s3665_s28 + $0x7a0] sm:$0xff]  ;;  %v2944_v33 = vpack.c.bf16 %v458_v26, %v457_v25  ;;  %v482_v25 = vld [vmem:[%s3665_s28 + $0x768] sm:$0xff]  ;;  %v467_v26 = vld [vmem:[%s3665_s28 + $0x6f0] sm:$0xff] }
  0xb5   : > { %2925 = vmatprep.subr.bf16.mxu1 %v2924_v32  ;;  %v2974_v32 = vpack.c.bf16 %v472_v24, %v471_v22  ;;  %v2976_v37 = vpack.c.bf16 %v490_v29, %v489_v28  ;;  %v450_v22 = vld [vmem:[%s3665_s28 + $0x668] sm:$0xff]  ;;  %v499_v28 = vld [vmem:[%s3665_s28 + $0x7f0] sm:$0xff]  ;;  %v500_v29 = vld [vmem:[%s3665_s28 + $0x7f8] sm:$0xff] }
  0xb6   : > { %v537_v13 = vld [vmem:[%s3665_s28 + $0x920] sm:$0xff] }
  0xb7   : > { %2895 = vmatpush3.bf16.msra.mxu0 %v2894_v39  ;;  %v459_v39 = vld [vmem:[%s3665_s28 + $0x6b0] sm:$0xff] }
  0xb8   : > { %2927 = vmatpush3.bf16.msra.mxu1 %v2926_v40  ;;  %2897 = vmatprep.subr.bf16.mxu0 %v2896_v41  ;;  %v460_v40 = vld [vmem:[%s3665_s28 + $0x6b8] sm:$0xff] }
  0xb9   : > { %2929 = vmatprep.subr.bf16.mxu1 %v2928_v47  ;;  %v492_v41 = vld [vmem:[%s3665_s28 + $0x7b8] sm:$0xff]  ;;  %v2948_v45 = vpack.c.bf16 %v460_v40, %v459_v39  ;;  %v443_v47 = vld [vmem:[%s3665_s28 + $0x630] sm:$0xff]  ;;  %v517_v39 = vld [vmem:[%s3665_s28 + $0x880] sm:$0xff] }
  0xba   : > { %v518_v40 = vld [vmem:[%s3665_s28 + $0x888] sm:$0xff] }
  0xbb   : > { %2899 = vmatpush3.bf16.msra.mxu0 %v2898_v54  ;;  %v462_v54 = vld [vmem:[%s3665_s28 + $0x6c8] sm:$0xff] }
  0xbc   : > { %2931 = vmatpush3.bf16.msra.mxu1 %v2930_v55  ;;  %2901 = vmatprep.subr.bf16.mxu0 %v2900_v56  ;;  %v494_v55 = vld [vmem:[%s3665_s28 + $0x7c8] sm:$0xff]  ;;  %v2950_v56 = vpack.c.bf16 %v444_v48, %v443_v47  ;;  %v2952_v58 = vpack.c.bf16 %v462_v54, %v461_v52  ;;  %v3000_v47 = vpack.c.bf16 %v518_v40, %v517_v39  ;;  %v501_v48 = vld [vmem:[%s3665_s28 + $0x800] sm:$0xff]  ;;  %v519_v54 = vld [vmem:[%s3665_s28 + $0x890] sm:$0xff] }
  0xbd   : > { %2933 = vmatprep.subr.bf16.mxu1 %v2932_v60  ;;  %v446_v60 = vld [vmem:[%s3665_s28 + $0x648] sm:$0xff]  ;;  %v2984_v46 = vpack.c.bf16 %v494_v55, %v493_v34  ;;  %v520_v34 = vld [vmem:[%s3665_s28 + $0x898] sm:$0xff] }
  0xbe   : > { %v534_v52 = vld [vmem:[%s3665_s28 + $0x908] sm:$0xff] }
  0xbf   : > { %2903 = vmatpush3.bf16.msra.mxu0 %v2902_v2  ;;  %v496_v2 = vld [vmem:[%s3665_s28 + $0x7d8] sm:$0xff]  ;;  %v542_v40 = vld [vmem:[%s3665_s28 + $0x948] sm:$0xff] }
  0xc0   : > { %2935 = vmatpush3.bf16.msra.mxu1 %v2934_v3  ;;  %2937 = vmatprep.subr.bf16.mxu0 %v2936_v4  ;;  %v2954_v3 = vpack.c.bf16 %v446_v60, %v445_v59  ;;  %v2986_v4 = vpack.c.bf16 %v478_v62, %v477_v61  ;;  %v2988_v9 = vpack.c.bf16 %v496_v2, %v495_v1  ;;  %v504_v62 = vld [vmem:[%s3665_s28 + $0x818] sm:$0xff]  ;;  %v521_v2 = vld [vmem:[%s3665_s28 + $0x8a0] sm:$0xff] }
  0xc1   : > { %2969 = vmatprep.subr.bf16.mxu1 %v2968_v8  ;;  %v479_v8 = vld [vmem:[%s3665_s28 + $0x750] sm:$0xff]  ;;  %v3002_v59 = vpack.c.bf16 %v502_v49, %v501_v48  ;;  %v3004_v61 = vpack.c.bf16 %v520_v34, %v519_v54  ;;  %v536_v1 = vld [vmem:[%s3665_s28 + $0x918] sm:$0xff]  ;;  %v529_v34 = vld [vmem:[%s3665_s28 + $0x8e0] sm:$0xff] }
  0xc2   : > { %1278 = vmatmul.mubr.f32.vlgmr.msra.gmra.mrb[4].mxu0 %v3841_v43  ;;  %v442_v43 = vld [vmem:[%s3665_s28 + $0x628] sm:$0xff]  ;;  %v511_v49 = vld [vmem:[%s3665_s28 + $0x850] sm:$0xff]  ;;  %v544_v54 = vld [vmem:[%s3665_s28 + $0x958] sm:$0xff] }
  0xc3   : > { %2939 = vmatpush3.bf16.msra.mxu0 %v2938_v17  ;;  %1348 = vmatmul.mubr.f32.vlgmr.msra.gmra.mrb[4].mxu1 %v3852_v53  ;;  %v491_v53 = vld [vmem:[%s3665_s28 + $0x7b0] sm:$0xff]  ;;  %v2946_v42 = vpack.c.bf16 %v442_v43, %v441_v35  ;;  %v498_v17 = vld [vmem:[%s3665_s28 + $0x7e8] sm:$0xff]  ;;  %v452_v43 = vld [vmem:[%s3665_s28 + $0x678] sm:$0xff] }
  0xc4   : > { %2971 = vmatpush3.bf16.msra.mxu1 %v2970_v18  ;;  %2941 = vmatprep.subr.bf16.mxu0 %v2940_v19  ;;  %v2980_v50 = vpack.c.bf16 %v492_v41, %v491_v53  ;;  %v2958_v18 = vpack.c.bf16 %v448_v7, %v447_v6  ;;  %v2990_v19 = vpack.c.bf16 %v480_v10, %v479_v8  ;;  %v451_v35 = vld [vmem:[%s3665_s28 + $0x670] sm:$0xff]  ;;  %v549_v53 = vld [vmem:[%s3665_s28 + $0x980] sm:$0xff]  ;;  %v550_v41 = vld [vmem:[%s3665_s28 + $0x988] sm:$0xff] }
  0xc5   : > { %2973 = vmatprep.subr.bf16.mxu1 %v2972_v23  ;;  %1417 = vmatprep.mubr.f32.mxu0 %v831_v27  ;;  %v481_v23 = vld [vmem:[%s3665_s28 + $0x760] sm:$0xff]  ;;  %v2992_v24 = vpack.c.bf16 %v498_v17, %v497_v15  ;;  %v468_v27 = vld [vmem:[%s3665_s28 + $0x6f8] sm:$0xff]  ;;  %v3032_v51 = vpack.c.bf16 %v550_v41, %v549_v53  ;;  %v554_v6 = vld [vmem:[%s3665_s28 + $0x9a8] sm:$0xff] }
  0xc6   : > { %1487 = vmatprep.mubr.f32.mxu1 %v832_v30  ;;  %v2962_v30 = vpack.c.bf16 %v450_v22, %v449_v21  ;;  %v538_v17 = vld [vmem:[%s3665_s28 + $0x928] sm:$0xff]  ;;  %v527_v53 = vld [vmem:[%s3665_s28 + $0x8d0] sm:$0xff]  ;;  %v528_v41 = vld [vmem:[%s3665_s28 + $0x8d8] sm:$0xff] }
  0xc7   : > { %2943 = vmatpush3.bf16.msra.mxu0 %v2942_v31  ;;  %v241_v31 = vld [vmem:[%s3659_s4 + $0x20] sm:$0xff]  ;;  %v3042_v22 = vpack.c.bf16 %v538_v17, %v537_v13  ;;  %v3020_v48 = vpack.c.bf16 %v528_v41, %v527_v53  ;;  %v547_v13 = vld [vmem:[%s3665_s28 + $0x970] sm:$0xff]  ;;  %v548_v17 = vld [vmem:[%s3665_s28 + $0x978] sm:$0xff] }
  0xc8   : > { %2975 = vmatpush3.bf16.msra.mxu1 %v2974_v32  ;;  %2945 = vmatprep.subr.bf16.mxu0 %v2944_v33  ;;  %v2994_v32 = vpack.c.bf16 %v482_v25, %v481_v23  ;;  %v2964_v33 = vpack.c.bf16 %v468_v27, %v467_v26  ;;  %v3990_v55 = vrot.slane %v241_v31, %v3730_v14  ;;  %v508_v25 = vld [vmem:[%s3665_s28 + $0x838] sm:$0xff]  ;;  %v539_v26 = vld [vmem:[%s3665_s28 + $0x930] sm:$0xff] }
  0xc9   : > { %2977 = vmatprep.subr.bf16.mxu1 %v2976_v37  ;;  %v2996_v37 = vpack.c.bf16 %v500_v29, %v499_v28  ;;  %v540_v28 = vld [vmem:[%s3665_s28 + $0x938] sm:$0xff]  ;;  %v525_v29 = vld [vmem:[%s3665_s28 + $0x8c0] sm:$0xff]  ;;  %v599_v53 = vld [vmem:[%s3665_s28 + $0xb10] sm:$0xff] }
  0xcb   : > { %2947 = vmatpush3.bf16.msra.mxu0 %v2946_v42  ;;  %v833_v42 = vcombine.high %v241_v31, %v241_v31  ;;  %v557_v31 = vld [vmem:[%s3665_s28 + $0x9c0] sm:$0xff] }
  0xcc   : > { %2979 = vmatpush3.bf16.msra.mxu1 %v2978_v44  ;;  %2949 = vmatprep.subr.bf16.mxu0 %v2948_v45  ;;  %v2966_v44 = vpack.c.bf16 %v452_v43, %v451_v35  ;;  %v2998_v45 = vpack.c.bf16 %v484_v38, %v483_v36  ;;  %v3046_v35 = vpack.c.bf16 %v540_v28, %v539_v26  ;;  %v509_v36 = vld [vmem:[%s3665_s28 + $0x840] sm:$0xff]  ;;  %v566_v26 = vld [vmem:[%s3665_s28 + $0xa08] sm:$0xff] }
  0xcd   : > { %2981 = vmatprep.subr.bf16.mxu1 %v2980_v50  ;;  %v533_v50 = vld [vmem:[%s3665_s28 + $0x900] sm:$0xff] }
  0xce   : > { %v3034_v60 = vpack.c.bf16 %v534_v52, %v533_v50  ;;  %v541_v38 = vld [vmem:[%s3665_s28 + $0x940] sm:$0xff]  ;;  %v512_v50 = vld [vmem:[%s3665_s28 + $0x858] sm:$0xff] }
  0xcf   : > { %2951 = vmatpush3.bf16.msra.mxu0 %v2950_v56  ;;  %v551_v56 = vld [vmem:[%s3665_s28 + $0x990] sm:$0xff] }
  0xd0   : > { %2983 = vmatpush3.bf16.msra.mxu1 %v2982_v57  ;;  %2953 = vmatprep.subr.bf16.mxu0 %v2952_v58  ;;  %v552_v57 = vld [vmem:[%s3665_s28 + $0x998] sm:$0xff]  ;;  %v3995_v58 = vrot.slane %v833_v42, %v3730_v14  ;;  %v559_v42 = vld [vmem:[%s3665_s28 + $0x9d0] sm:$0xff] }
  0xd1   : > { %2985 = vmatprep.subr.bf16.mxu1 %v2984_v46  ;;  %v503_v46 = vld [vmem:[%s3665_s28 + $0x810] sm:$0xff]  ;;  %v3036_v0 = vpack.c.bf16 %v552_v57, %v551_v56  ;;  %v530_v56 = vld [vmem:[%s3665_s28 + $0x8e8] sm:$0xff]  ;;  %v561_v57 = vld [vmem:[%s3665_s28 + $0x9e0] sm:$0xff] }
  0xd2   : > { %v849_v7 = vcombine.high %v3995_v58, %v3995_v58  ;;  %v3006_v8 = vpack.c.bf16 %v504_v62, %v503_v46  ;;  %v3024_v46 = vpack.c.bf16 %v530_v56, %v529_v34  ;;  %v513_v62 = vld [vmem:[%s3665_s28 + $0x860] sm:$0xff] }
  0xd3   : > { %2955 = vmatpush3.bf16.msra.mxu0 %v2954_v3  ;;  %v522_v3 = vld [vmem:[%s3665_s28 + $0x8a8] sm:$0xff]  ;;  %v569_v34 = vld [vmem:[%s3665_s28 + $0xa20] sm:$0xff] }
  0xd4   : > { %2987 = vmatpush3.bf16.msra.mxu1 %v2986_v4  ;;  %2957 = vmatprep.subr.bf16.mxu0 %v2956_v5  ;;  %v848_v4 = vcombine.high %v3990_v55, %v3990_v55  ;;  %v553_v5 = vld [vmem:[%s3665_s28 + $0x9a0] sm:$0xff]  ;;  %v3008_v10 = vpack.c.bf16 %v522_v3, %v521_v2  ;;  %v546_v2 = vld [vmem:[%s3665_s28 + $0x968] sm:$0xff]  ;;  %v531_v3 = vld [vmem:[%s3665_s28 + $0x8f0] sm:$0xff] }
  0xd5   : > { %2989 = vmatprep.subr.bf16.mxu1 %v2988_v9  ;;  %v3038_v9 = vpack.c.bf16 %v536_v1, %v535_v63  ;;  %v3040_v15 = vpack.c.bf16 %v554_v6, %v553_v5  ;;  %v514_v63 = vld [vmem:[%s3665_s28 + $0x868] sm:$0xff]  ;;  %v563_v5 = vld [vmem:[%s3665_s28 + $0x9f0] sm:$0xff]  ;;  %v564_v6 = vld [vmem:[%s3665_s28 + $0x9f8] sm:$0xff] }
  0xd6   : > { %v601_v56 = vld [vmem:[%s3665_s28 + $0xb20] sm:$0xff] }
  0xd7   : > { %2959 = vmatpush3.bf16.msra.mxu0 %v2958_v18  ;;  %v523_v18 = vld [vmem:[%s3665_s28 + $0x8b0] sm:$0xff] }
  0xd8   : > { %2991 = vmatpush3.bf16.msra.mxu1 %v2990_v19  ;;  %2961 = vmatprep.subr.bf16.mxu0 %v2960_v20  ;;  %v524_v19 = vld [vmem:[%s3665_s28 + $0x8b8] sm:$0xff] }
  0xd9   : > { %2993 = vmatprep.subr.bf16.mxu1 %v2992_v24  ;;  %v556_v20 = vld [vmem:[%s3665_s28 + $0x9b8] sm:$0xff]  ;;  %v3012_v23 = vpack.c.bf16 %v524_v19, %v523_v18  ;;  %v507_v24 = vld [vmem:[%s3665_s28 + $0x830] sm:$0xff]  ;;  %v581_v18 = vld [vmem:[%s3665_s28 + $0xa80] sm:$0xff] }
  0xda   : > { %v582_v19 = vld [vmem:[%s3665_s28 + $0xa88] sm:$0xff] }
  0xdb   : > { %2963 = vmatpush3.bf16.msra.mxu0 %v2962_v30  ;;  %v526_v30 = vld [vmem:[%s3665_s28 + $0x8c8] sm:$0xff] }
  0xdc   : > { %2995 = vmatpush3.bf16.msra.mxu1 %v2994_v32  ;;  %2965 = vmatprep.subr.bf16.mxu0 %v2964_v33  ;;  %v558_v32 = vld [vmem:[%s3665_s28 + $0x9c8] sm:$0xff]  ;;  %v3014_v33 = vpack.c.bf16 %v508_v25, %v507_v24  ;;  %v3016_v43 = vpack.c.bf16 %v526_v30, %v525_v29  ;;  %v3064_v24 = vpack.c.bf16 %v582_v19, %v581_v18  ;;  %v565_v25 = vld [vmem:[%s3665_s28 + $0xa00] sm:$0xff]  ;;  %v583_v30 = vld [vmem:[%s3665_s28 + $0xa90] sm:$0xff] }
  0xdd   : > { %2997 = vmatprep.subr.bf16.mxu1 %v2996_v37  ;;  %v510_v37 = vld [vmem:[%s3665_s28 + $0x848] sm:$0xff]  ;;  %v3048_v39 = vpack.c.bf16 %v558_v32, %v557_v31  ;;  %v584_v31 = vld [vmem:[%s3665_s28 + $0xa98] sm:$0xff] }
  0xde   : > { %v598_v29 = vld [vmem:[%s3665_s28 + $0xb08] sm:$0xff] }
  0xdf   : > { %2967 = vmatpush3.bf16.msra.mxu0 %v2966_v44  ;;  %v560_v44 = vld [vmem:[%s3665_s28 + $0x9d8] sm:$0xff]  ;;  %v606_v19 = vld [vmem:[%s3665_s28 + $0xb48] sm:$0xff] }
  0xe0   : > { %2999 = vmatpush3.bf16.msra.mxu1 %v2998_v45  ;;  %3001 = vmatprep.subr.bf16.mxu0 %v3000_v47  ;;  %v3018_v45 = vpack.c.bf16 %v510_v37, %v509_v36  ;;  %v3050_v47 = vpack.c.bf16 %v542_v40, %v541_v38  ;;  %v3052_v52 = vpack.c.bf16 %v560_v44, %v559_v42  ;;  %v568_v40 = vld [vmem:[%s3665_s28 + $0xa18] sm:$0xff]  ;;  %v585_v44 = vld [vmem:[%s3665_s28 + $0xaa0] sm:$0xff] }
  0xe1   : > { %3033 = vmatprep.subr.bf16.mxu1 %v3032_v51  ;;  %v543_v51 = vld [vmem:[%s3665_s28 + $0x950] sm:$0xff]  ;;  %v3066_v36 = vpack.c.bf16 %v566_v26, %v565_v25  ;;  %v3068_v38 = vpack.c.bf16 %v584_v31, %v583_v30  ;;  %v600_v42 = vld [vmem:[%s3665_s28 + $0xb18] sm:$0xff]  ;;  %v593_v31 = vld [vmem:[%s3665_s28 + $0xae0] sm:$0xff] }
  0xe2   : > { %1418 = vmatmul.mubr.f32.vlgmr.msra.gmra.mrb[6].mxu0 %v3913_v12  ;;  %v506_v12 = vld [vmem:[%s3665_s28 + $0x828] sm:$0xff]  ;;  %v575_v26 = vld [vmem:[%s3665_s28 + $0xa50] sm:$0xff]  ;;  %v608_v30 = vld [vmem:[%s3665_s28 + $0xb58] sm:$0xff] }
  0xe3   : > { %3003 = vmatpush3.bf16.msra.mxu0 %v3002_v59  ;;  %1488 = vmatmul.mubr.f32.vlgmr.msra.gmra.mrb[6].mxu1 %v3918_v16  ;;  %v555_v16 = vld [vmem:[%s3665_s28 + $0x9b0] sm:$0xff]  ;;  %v3010_v21 = vpack.c.bf16 %v506_v12, %v505_v11  ;;  %v562_v59 = vld [vmem:[%s3665_s28 + $0x9e8] sm:$0xff]  ;;  %v516_v12 = vld [vmem:[%s3665_s28 + $0x878] sm:$0xff] }
  0xe4   : > { %3035 = vmatpush3.bf16.msra.mxu1 %v3034_v60  ;;  %3005 = vmatprep.subr.bf16.mxu0 %v3004_v61  ;;  %v3044_v27 = vpack.c.bf16 %v556_v20, %v555_v16  ;;  %v3022_v60 = vpack.c.bf16 %v512_v50, %v511_v49  ;;  %v3054_v61 = vpack.c.bf16 %v544_v54, %v543_v51  ;;  %v515_v11 = vld [vmem:[%s3665_s28 + $0x870] sm:$0xff]  ;;  %v613_v16 = vld [vmem:[%s3665_s28 + $0xb80] sm:$0xff]  ;;  %v614_v20 = vld [vmem:[%s3665_s28 + $0xb88] sm:$0xff] }
  0xe5   : > { %3037 = vmatprep.subr.bf16.mxu1 %v3036_v0  ;;  %1557 = vmatprep.mubr.f32.mxu0 %v848_v4  ;;  %v545_v0 = vld [vmem:[%s3665_s28 + $0x960] sm:$0xff]  ;;  %v3056_v1 = vpack.c.bf16 %v562_v59, %v561_v57  ;;  %v532_v4 = vld [vmem:[%s3665_s28 + $0x8f8] sm:$0xff]  ;;  %v3096_v28 = vpack.c.bf16 %v614_v20, %v613_v16  ;;  %v618_v49 = vld [vmem:[%s3665_s28 + $0xba8] sm:$0xff] }
  0xe6   : > { %1627 = vmatprep.mubr.f32.mxu1 %v849_v7  ;;  %v3026_v7 = vpack.c.bf16 %v514_v63, %v513_v62  ;;  %v602_v59 = vld [vmem:[%s3665_s28 + $0xb28] sm:$0xff]  ;;  %v591_v16 = vld [vmem:[%s3665_s28 + $0xad0] sm:$0xff]  ;;  %v592_v20 = vld [vmem:[%s3665_s28 + $0xad8] sm:$0xff] }
  0xe7   : > { %3007 = vmatpush3.bf16.msra.mxu0 %v3006_v8  ;;  %v242_v8 = vld [vmem:[%s3659_s4 + $0x28] sm:$0xff]  ;;  %v3106_v63 = vpack.c.bf16 %v602_v59, %v601_v56  ;;  %v3084_v25 = vpack.c.bf16 %v592_v20, %v591_v16  ;;  %v611_v56 = vld [vmem:[%s3665_s28 + $0xb70] sm:$0xff]  ;;  %v612_v59 = vld [vmem:[%s3665_s28 + $0xb78] sm:$0xff] }
  0xe8   : > { %3039 = vmatpush3.bf16.msra.mxu1 %v3038_v9  ;;  %3009 = vmatprep.subr.bf16.mxu0 %v3008_v10  ;;  %v3058_v9 = vpack.c.bf16 %v546_v2, %v545_v0  ;;  %v3028_v10 = vpack.c.bf16 %v532_v4, %v531_v3  ;;  %v4067_v32 = vrot.slane %v242_v8, %v3730_v14  ;;  %v572_v2 = vld [vmem:[%s3665_s28 + $0xa38] sm:$0xff]  ;;  %v603_v3 = vld [vmem:[%s3665_s28 + $0xb30] sm:$0xff] }
  0xe9   : > { %3041 = vmatprep.subr.bf16.mxu1 %v3040_v15  ;;  %v3060_v15 = vpack.c.bf16 %v564_v6, %v563_v5  ;;  %v604_v5 = vld [vmem:[%s3665_s28 + $0xb38] sm:$0xff]  ;;  %v589_v6 = vld [vmem:[%s3665_s28 + $0xac0] sm:$0xff]  ;;  %v663_v16 = vld [vmem:[%s3665_s28 + $0xd10] sm:$0xff] }
  0xeb   : > { %3011 = vmatpush3.bf16.msra.mxu0 %v3010_v21  ;;  %v850_v21 = vcombine.high %v242_v8, %v242_v8  ;;  %v621_v8 = vld [vmem:[%s3665_s28 + $0xbc0] sm:$0xff] }
  0xec   : > { %3043 = vmatpush3.bf16.msra.mxu1 %v3042_v22  ;;  %3013 = vmatprep.subr.bf16.mxu0 %v3012_v23  ;;  %v3030_v22 = vpack.c.bf16 %v516_v12, %v515_v11  ;;  %v3062_v23 = vpack.c.bf16 %v548_v17, %v547_v13  ;;  %v3110_v11 = vpack.c.bf16 %v604_v5, %v603_v3  ;;  %v573_v13 = vld [vmem:[%s3665_s28 + $0xa40] sm:$0xff]  ;;  %v630_v3 = vld [vmem:[%s3665_s28 + $0xc08] sm:$0xff] }
  0xed   : > { %3045 = vmatprep.subr.bf16.mxu1 %v3044_v27  ;;  %v597_v27 = vld [vmem:[%s3665_s28 + $0xb00] sm:$0xff] }
  0xee   : > { %v3098_v37 = vpack.c.bf16 %v598_v29, %v597_v27  ;;  %v605_v17 = vld [vmem:[%s3665_s28 + $0xb40] sm:$0xff]  ;;  %v576_v27 = vld [vmem:[%s3665_s28 + $0xa58] sm:$0xff] }
  0xef   : > { %3015 = vmatpush3.bf16.msra.mxu0 %v3014_v33  ;;  %v615_v33 = vld [vmem:[%s3665_s28 + $0xb90] sm:$0xff] }
  0xf0   : > { %3047 = vmatpush3.bf16.msra.mxu1 %v3046_v35  ;;  %3017 = vmatprep.subr.bf16.mxu0 %v3016_v43  ;;  %v616_v35 = vld [vmem:[%s3665_s28 + $0xb98] sm:$0xff]  ;;  %v4072_v43 = vrot.slane %v850_v21, %v3730_v14  ;;  %v623_v21 = vld [vmem:[%s3665_s28 + $0xbd0] sm:$0xff] }
  0xf1   : > { %3049 = vmatprep.subr.bf16.mxu1 %v3048_v39  ;;  %v567_v39 = vld [vmem:[%s3665_s28 + $0xa10] sm:$0xff]  ;;  %v3100_v41 = vpack.c.bf16 %v616_v35, %v615_v33  ;;  %v594_v33 = vld [vmem:[%s3665_s28 + $0xae8] sm:$0xff]  ;;  %v625_v35 = vld [vmem:[%s3665_s28 + $0xbe0] sm:$0xff] }
  0xf2   : > { %v866_v50 = vcombine.high %v4072_v43, %v4072_v43  ;;  %v3070_v51 = vpack.c.bf16 %v568_v40, %v567_v39  ;;  %v3088_v39 = vpack.c.bf16 %v594_v33, %v593_v31  ;;  %v577_v40 = vld [vmem:[%s3665_s28 + $0xa60] sm:$0xff] }
  0xf3   : > { %3019 = vmatpush3.bf16.msra.mxu0 %v3018_v45  ;;  %v586_v45 = vld [vmem:[%s3665_s28 + $0xaa8] sm:$0xff]  ;;  %v633_v31 = vld [vmem:[%s3665_s28 + $0xc20] sm:$0xff] }
  0xf4   : > { %3051 = vmatpush3.bf16.msra.mxu1 %v3050_v47  ;;  %3021 = vmatprep.subr.bf16.mxu0 %v3020_v48  ;;  %v865_v47 = vcombine.high %v4067_v32, %v4067_v32  ;;  %v617_v48 = vld [vmem:[%s3665_s28 + $0xba0] sm:$0xff]  ;;  %v3072_v54 = vpack.c.bf16 %v586_v45, %v585_v44  ;;  %v610_v44 = vld [vmem:[%s3665_s28 + $0xb68] sm:$0xff]  ;;  %v595_v45 = vld [vmem:[%s3665_s28 + $0xaf0] sm:$0xff] }
  0xf5   : > { %3053 = vmatprep.subr.bf16.mxu1 %v3052_v52  ;;  %v3102_v52 = vpack.c.bf16 %v600_v42, %v599_v53  ;;  %v3104_v57 = vpack.c.bf16 %v618_v49, %v617_v48  ;;  %v578_v53 = vld [vmem:[%s3665_s28 + $0xa68] sm:$0xff]  ;;  %v627_v48 = vld [vmem:[%s3665_s28 + $0xbf0] sm:$0xff]  ;;  %v628_v49 = vld [vmem:[%s3665_s28 + $0xbf8] sm:$0xff] }
  0xf6   : > { %v665_v33 = vld [vmem:[%s3665_s28 + $0xd20] sm:$0xff] }
  0xf7   : > { %3023 = vmatpush3.bf16.msra.mxu0 %v3022_v60  ;;  %v587_v60 = vld [vmem:[%s3665_s28 + $0xab0] sm:$0xff] }
  0xf8   : > { %3055 = vmatpush3.bf16.msra.mxu1 %v3054_v61  ;;  %3025 = vmatprep.subr.bf16.mxu0 %v3024_v46  ;;  %v588_v61 = vld [vmem:[%s3665_s28 + $0xab8] sm:$0xff] }
  0xf9   : > { %3057 = vmatprep.subr.bf16.mxu1 %v3056_v1  ;;  %v620_v46 = vld [vmem:[%s3665_s28 + $0xbb8] sm:$0xff]  ;;  %v3076_v0 = vpack.c.bf16 %v588_v61, %v587_v60  ;;  %v571_v1 = vld [vmem:[%s3665_s28 + $0xa30] sm:$0xff]  ;;  %v645_v60 = vld [vmem:[%s3665_s28 + $0xc80] sm:$0xff] }
  0xfa   : > { %v646_v61 = vld [vmem:[%s3665_s28 + $0xc88] sm:$0xff] }
  0xfb   : > { %3027 = vmatpush3.bf16.msra.mxu0 %v3026_v7  ;;  %v590_v7 = vld [vmem:[%s3665_s28 + $0xac8] sm:$0xff] }
  0xfc   : > { %3059 = vmatpush3.bf16.msra.mxu1 %v3058_v9  ;;  %3029 = vmatprep.subr.bf16.mxu0 %v3028_v10  ;;  %v622_v9 = vld [vmem:[%s3665_s28 + $0xbc8] sm:$0xff]  ;;  %v3078_v10 = vpack.c.bf16 %v572_v2, %v571_v1  ;;  %v3080_v12 = vpack.c.bf16 %v590_v7, %v589_v6  ;;  %v3128_v1 = vpack.c.bf16 %v646_v61, %v645_v60  ;;  %v629_v2 = vld [vmem:[%s3665_s28 + $0xc00] sm:$0xff]  ;;  %v647_v7 = vld [vmem:[%s3665_s28 + $0xc90] sm:$0xff] }
  0xfd   : > { %3061 = vmatprep.subr.bf16.mxu1 %v3060_v15  ;;  %v574_v15 = vld [vmem:[%s3665_s28 + $0xa48] sm:$0xff]  ;;  %v3112_v18 = vpack.c.bf16 %v622_v9, %v621_v8  ;;  %v648_v8 = vld [vmem:[%s3665_s28 + $0xc98] sm:$0xff] }
  0xfe   : > { %v662_v6 = vld [vmem:[%s3665_s28 + $0xd08] sm:$0xff] }
  0xff   : > { %3031 = vmatpush3.bf16.msra.mxu0 %v3030_v22  ;;  %v624_v22 = vld [vmem:[%s3665_s28 + $0xbd8] sm:$0xff]  ;;  %v670_v61 = vld [vmem:[%s3665_s28 + $0xd48] sm:$0xff] }
 0x100   : > { %3063 = vmatpush3.bf16.msra.mxu1 %v3062_v23  ;;  %3065 = vmatprep.subr.bf16.mxu0 %v3064_v24  ;;  %v3082_v23 = vpack.c.bf16 %v574_v15, %v573_v13  ;;  %v3114_v24 = vpack.c.bf16 %v606_v19, %v605_v17  ;;  %v3116_v29 = vpack.c.bf16 %v624_v22, %v623_v21  ;;  %v632_v19 = vld [vmem:[%s3665_s28 + $0xc18] sm:$0xff]  ;;  %v649_v22 = vld [vmem:[%s3665_s28 + $0xca0] sm:$0xff] }
 0x101   : > { %3097 = vmatprep.subr.bf16.mxu1 %v3096_v28  ;;  %v607_v28 = vld [vmem:[%s3665_s28 + $0xb50] sm:$0xff]  ;;  %v3130_v13 = vpack.c.bf16 %v630_v3, %v629_v2  ;;  %v3132_v17 = vpack.c.bf16 %v648_v8, %v647_v7  ;;  %v664_v21 = vld [vmem:[%s3665_s28 + $0xd18] sm:$0xff]  ;;  %v657_v8 = vld [vmem:[%s3665_s28 + $0xce0] sm:$0xff] }
 0x102   : > { %1558 = vmatmul.mubr.f32.vlgmr.msra.gmra.mrb[8].mxu0 %v3990_v55  ;;  %v570_v55 = vld [vmem:[%s3665_s28 + $0xa28] sm:$0xff]  ;;  %v639_v3 = vld [vmem:[%s3665_s28 + $0xc50] sm:$0xff]  ;;  %v672_v7 = vld [vmem:[%s3665_s28 + $0xd58] sm:$0xff] }
 0x103   : > { %3067 = vmatpush3.bf16.msra.mxu0 %v3066_v36  ;;  %1628 = vmatmul.mubr.f32.vlgmr.msra.gmra.mrb[8].mxu1 %v3995_v58  ;;  %v619_v58 = vld [vmem:[%s3665_s28 + $0xbb0] sm:$0xff]  ;;  %v3074_v62 = vpack.c.bf16 %v570_v55, %v569_v34  ;;  %v626_v36 = vld [vmem:[%s3665_s28 + $0xbe8] sm:$0xff]  ;;  %v580_v55 = vld [vmem:[%s3665_s28 + $0xa78] sm:$0xff] }
 0x104   : > { %3099 = vmatpush3.bf16.msra.mxu1 %v3098_v37  ;;  %3069 = vmatprep.subr.bf16.mxu0 %v3068_v38  ;;  %v3108_v4 = vpack.c.bf16 %v620_v46, %v619_v58  ;;  %v3086_v37 = vpack.c.bf16 %v576_v27, %v575_v26  ;;  %v3118_v38 = vpack.c.bf16 %v608_v30, %v607_v28  ;;  %v579_v34 = vld [vmem:[%s3665_s28 + $0xa70] sm:$0xff]  ;;  %v677_v58 = vld [vmem:[%s3665_s28 + $0xd80] sm:$0xff]  ;;  %v678_v46 = vld [vmem:[%s3665_s28 + $0xd88] sm:$0xff] }
 0x105   : > { %3101 = vmatprep.subr.bf16.mxu1 %v3100_v41  ;;  %1697 = vmatprep.mubr.f32.mxu0 %v865_v47  ;;  %v609_v41 = vld [vmem:[%s3665_s28 + $0xb60] sm:$0xff]  ;;  %v3120_v42 = vpack.c.bf16 %v626_v36, %v625_v35  ;;  %v596_v47 = vld [vmem:[%s3665_s28 + $0xaf8] sm:$0xff]  ;;  %v3160_v5 = vpack.c.bf16 %v678_v46, %v677_v58  ;;  %v682_v26 = vld [vmem:[%s3665_s28 + $0xda8] sm:$0xff] }
 0x106   : > { %1767 = vmatprep.mubr.f32.mxu1 %v866_v50  ;;  %v3090_v50 = vpack.c.bf16 %v578_v53, %v577_v40  ;;  %v666_v36 = vld [vmem:[%s3665_s28 + $0xd28] sm:$0xff]  ;;  %v655_v58 = vld [vmem:[%s3665_s28 + $0xcd0] sm:$0xff]  ;;  %v656_v46 = vld [vmem:[%s3665_s28 + $0xcd8] sm:$0xff] }
 0x107   : > { %3071 = vmatpush3.bf16.msra.mxu0 %v3070_v51  ;;  %v243_v51 = vld [vmem:[%s3659_s4 + $0x30] sm:$0xff]  ;;  %v3170_v53 = vpack.c.bf16 %v666_v36, %v665_v33  ;;  %v3148_v2 = vpack.c.bf16 %v656_v46, %v655_v58  ;;  %v676_v36 = vld [vmem:[%s3665_s28 + $0xd78] sm:$0xff] }
 0x108   : > { %3103 = vmatpush3.bf16.msra.mxu1 %v3102_v52  ;;  %3073 = vmatprep.subr.bf16.mxu0 %v3072_v54  ;;  %v3122_v52 = vpack.c.bf16 %v610_v44, %v609_v41  ;;  %v3092_v54 = vpack.c.bf16 %v596_v47, %v595_v45  ;;  %v4144_v9 = vrot.slane %v243_v51, %v3730_v14  ;;  %v636_v44 = vld [vmem:[%s3665_s28 + $0xc38] sm:$0xff]  ;;  %v667_v45 = vld [vmem:[%s3665_s28 + $0xd30] sm:$0xff] }
 0x109   : > { %3105 = vmatprep.subr.bf16.mxu1 %v3104_v57  ;;  %v3124_v57 = vpack.c.bf16 %v628_v49, %v627_v48  ;;  %v668_v48 = vld [vmem:[%s3665_s28 + $0xd38] sm:$0xff]  ;;  %v653_v49 = vld [vmem:[%s3665_s28 + $0xcc0] sm:$0xff]  ;;  %v675_v33 = vld [vmem:[%s3665_s28 + $0xd70] sm:$0xff] }
 0x10a   : > { %v727_v58 = vld [vmem:[%s3665_s28 + $0xf10] sm:$0xff] }
 0x10b   : > { %3075 = vmatpush3.bf16.msra.mxu0 %v3074_v62  ;;  %v867_v62 = vcombine.high %v243_v51, %v243_v51  ;;  %v685_v51 = vld [vmem:[%s3665_s28 + $0xdc0] sm:$0xff] }
 0x10c   : > { %3107 = vmatpush3.bf16.msra.mxu1 %v3106_v63  ;;  %3077 = vmatprep.subr.bf16.mxu0 %v3076_v0  ;;  %v3094_v63 = vpack.c.bf16 %v580_v55, %v579_v34  ;;  %v3126_v0 = vpack.c.bf16 %v612_v59, %v611_v56  ;;  %v3174_v34 = vpack.c.bf16 %v668_v48, %v667_v45  ;;  %v637_v56 = vld [vmem:[%s3665_s28 + $0xc40] sm:$0xff]  ;;  %v694_v45 = vld [vmem:[%s3665_s28 + $0xe08] sm:$0xff] }
 0x10d   : > { %3109 = vmatprep.subr.bf16.mxu1 %v3108_v4  ;;  %v661_v4 = vld [vmem:[%s3665_s28 + $0xd00] sm:$0xff] }
 0x10e   : > { %v3162_v15 = vpack.c.bf16 %v662_v6, %v661_v4  ;;  %v669_v59 = vld [vmem:[%s3665_s28 + $0xd40] sm:$0xff]  ;;  %v640_v4 = vld [vmem:[%s3665_s28 + $0xc58] sm:$0xff] }
 0x10f   : > { %3079 = vmatpush3.bf16.msra.mxu0 %v3078_v10  ;;  %v679_v10 = vld [vmem:[%s3665_s28 + $0xd90] sm:$0xff] }
 0x110   : > { %3111 = vmatpush3.bf16.msra.mxu1 %v3110_v11  ;;  %3081 = vmatprep.subr.bf16.mxu0 %v3080_v12  ;;  %v680_v11 = vld [vmem:[%s3665_s28 + $0xd98] sm:$0xff]  ;;  %v4149_v12 = vrot.slane %v867_v62, %v3730_v14  ;;  %v687_v62 = vld [vmem:[%s3665_s28 + $0xdd0] sm:$0xff] }
 0x111   : > { %3113 = vmatprep.subr.bf16.mxu1 %v3112_v18  ;;  %v631_v18 = vld [vmem:[%s3665_s28 + $0xc10] sm:$0xff]  ;;  %v3164_v20 = vpack.c.bf16 %v680_v11, %v679_v10  ;;  %v658_v10 = vld [vmem:[%s3665_s28 + $0xce8] sm:$0xff]  ;;  %v689_v11 = vld [vmem:[%s3665_s28 + $0xde0] sm:$0xff] }
 0x112   : > { %v883_v27 = vcombine.high %v4149_v12, %v4149_v12  ;;  %v3134_v28 = vpack.c.bf16 %v632_v19, %v631_v18  ;;  %v3152_v18 = vpack.c.bf16 %v658_v10, %v657_v8  ;;  %v641_v19 = vld [vmem:[%s3665_s28 + $0xc60] sm:$0xff] }
 0x113   : > { %3083 = vmatpush3.bf16.msra.mxu0 %v3082_v23  ;;  %v650_v23 = vld [vmem:[%s3665_s28 + $0xca8] sm:$0xff]  ;;  %v729_v8 = vld [vmem:[%s3665_s28 + $0xf20] sm:$0xff] }
 0x114   : > { %3115 = vmatpush3.bf16.msra.mxu1 %v3114_v24  ;;  %3085 = vmatprep.subr.bf16.mxu0 %v3084_v25  ;;  %v882_v24 = vcombine.high %v4144_v9, %v4144_v9  ;;  %v681_v25 = vld [vmem:[%s3665_s28 + $0xda0] sm:$0xff]  ;;  %v3136_v30 = vpack.c.bf16 %v650_v23, %v649_v22  ;;  %v674_v22 = vld [vmem:[%s3665_s28 + $0xd68] sm:$0xff]  ;;  %v659_v23 = vld [vmem:[%s3665_s28 + $0xcf0] sm:$0xff] }
 0x115   : > { %3117 = vmatprep.subr.bf16.mxu1 %v3116_v29  ;;  %v3166_v29 = vpack.c.bf16 %v664_v21, %v663_v16  ;;  %v3168_v35 = vpack.c.bf16 %v682_v26, %v681_v25  ;;  %v642_v16 = vld [vmem:[%s3665_s28 + $0xc68] sm:$0xff]  ;;  %v691_v25 = vld [vmem:[%s3665_s28 + $0xdf0] sm:$0xff]  ;;  %v692_v26 = vld [vmem:[%s3665_s28 + $0xdf8] sm:$0xff] }
 0x117   : > { %3087 = vmatpush3.bf16.msra.mxu0 %v3086_v37  ;;  %v651_v37 = vld [vmem:[%s3665_s28 + $0xcb0] sm:$0xff] }
 0x118   : > { %3119 = vmatpush3.bf16.msra.mxu1 %v3118_v38  ;;  %3089 = vmatprep.subr.bf16.mxu0 %v3088_v39  ;;  %v652_v38 = vld [vmem:[%s3665_s28 + $0xcb8] sm:$0xff] }
 0x119   : > { %3121 = vmatprep.subr.bf16.mxu1 %v3120_v42  ;;  %v684_v39 = vld [vmem:[%s3665_s28 + $0xdb8] sm:$0xff]  ;;  %v3140_v41 = vpack.c.bf16 %v652_v38, %v651_v37  ;;  %v635_v42 = vld [vmem:[%s3665_s28 + $0xc30] sm:$0xff]  ;;  %v709_v37 = vld [vmem:[%s3665_s28 + $0xe80] sm:$0xff] }
 0x11a   : > { %v710_v38 = vld [vmem:[%s3665_s28 + $0xe88] sm:$0xff] }
 0x11b   : > { %3091 = vmatpush3.bf16.msra.mxu0 %v3090_v50  ;;  %v654_v50 = vld [vmem:[%s3665_s28 + $0xcc8] sm:$0xff] }
 0x11c   : > { %3123 = vmatpush3.bf16.msra.mxu1 %v3122_v52  ;;  %3093 = vmatprep.subr.bf16.mxu0 %v3092_v54  ;;  %v686_v52 = vld [vmem:[%s3665_s28 + $0xdc8] sm:$0xff]  ;;  %v3142_v54 = vpack.c.bf16 %v636_v44, %v635_v42  ;;  %v3144_v55 = vpack.c.bf16 %v654_v50, %v653_v49  ;;  %v3192_v42 = vpack.c.bf16 %v710_v38, %v709_v37  ;;  %v693_v44 = vld [vmem:[%s3665_s28 + $0xe00] sm:$0xff]  ;;  %v711_v50 = vld [vmem:[%s3665_s28 + $0xe90] sm:$0xff] }
 0x11d   : > { %3125 = vmatprep.subr.bf16.mxu1 %v3124_v57  ;;  %v638_v57 = vld [vmem:[%s3665_s28 + $0xc48] sm:$0xff]  ;;  %v3176_v60 = vpack.c.bf16 %v686_v52, %v685_v51  ;;  %v712_v51 = vld [vmem:[%s3665_s28 + $0xe98] sm:$0xff]  ;;  %v719_v38 = vld [vmem:[%s3665_s28 + $0xed0] sm:$0xff] }
 0x11e   : > { %v726_v49 = vld [vmem:[%s3665_s28 + $0xf08] sm:$0xff] }
 0x11f   : > { %3095 = vmatpush3.bf16.msra.mxu0 %v3094_v63  ;;  %v688_v63 = vld [vmem:[%s3665_s28 + $0xdd8] sm:$0xff]  ;;  %v734_v37 = vld [vmem:[%s3665_s28 + $0xf48] sm:$0xff] }
 0x120   : > { %3127 = vmatpush3.bf16.msra.mxu1 %v3126_v0  ;;  %3129 = vmatprep.subr.bf16.mxu0 %v3128_v1  ;;  %v3146_v0 = vpack.c.bf16 %v638_v57, %v637_v56  ;;  %v3178_v1 = vpack.c.bf16 %v670_v61, %v669_v59  ;;  %v3180_v6 = vpack.c.bf16 %v688_v63, %v687_v62  ;;  %v696_v61 = vld [vmem:[%s3665_s28 + $0xe18] sm:$0xff]  ;;  %v713_v63 = vld [vmem:[%s3665_s28 + $0xea0] sm:$0xff] }
 0x121   : > { %3161 = vmatprep.subr.bf16.mxu1 %v3160_v5  ;;  %v671_v5 = vld [vmem:[%s3665_s28 + $0xd50] sm:$0xff]  ;;  %v3194_v56 = vpack.c.bf16 %v694_v45, %v693_v44  ;;  %v3196_v59 = vpack.c.bf16 %v712_v51, %v711_v50  ;;  %v728_v62 = vld [vmem:[%s3665_s28 + $0xf18] sm:$0xff]  ;;  %v721_v50 = vld [vmem:[%s3665_s28 + $0xee0] sm:$0xff] }
 0x122   : > { %1698 = vmatmul.mubr.f32.vlgmr.msra.gmra.mrb[10].mxu0 %v4067_v32  ;;  %v634_v32 = vld [vmem:[%s3665_s28 + $0xc28] sm:$0xff]  ;;  %v703_v44 = vld [vmem:[%s3665_s28 + $0xe50] sm:$0xff]  ;;  %v704_v45 = vld [vmem:[%s3665_s28 + $0xe58] sm:$0xff] }
 0x123   : > { %3131 = vmatpush3.bf16.msra.mxu0 %v3130_v13  ;;  %1768 = vmatmul.mubr.f32.vlgmr.msra.gmra.mrb[10].mxu1 %v4072_v43  ;;  %v683_v43 = vld [vmem:[%s3665_s28 + $0xdb0] sm:$0xff]  ;;  %v3138_v40 = vpack.c.bf16 %v634_v32, %v633_v31  ;;  %v690_v13 = vld [vmem:[%s3665_s28 + $0xde8] sm:$0xff]  ;;  %v644_v32 = vld [vmem:[%s3665_s28 + $0xc78] sm:$0xff] }
 0x124   : > { %3163 = vmatpush3.bf16.msra.mxu1 %v3162_v15  ;;  %3133 = vmatprep.subr.bf16.mxu0 %v3132_v17  ;;  %v3172_v47 = vpack.c.bf16 %v684_v39, %v683_v43  ;;  %v3150_v15 = vpack.c.bf16 %v640_v4, %v639_v3  ;;  %v3182_v17 = vpack.c.bf16 %v672_v7, %v671_v5  ;;  %v643_v31 = vld [vmem:[%s3665_s28 + $0xc70] sm:$0xff]  ;;  %v741_v43 = vld [vmem:[%s3665_s28 + $0xf80] sm:$0xff]  ;;  %v742_v39 = vld [vmem:[%s3665_s28 + $0xf88] sm:$0xff] }
 0x125   : > { %3165 = vmatprep.subr.bf16.mxu1 %v3164_v20  ;;  %1837 = vmatprep.mubr.f32.mxu0 %v882_v24  ;;  %v673_v20 = vld [vmem:[%s3665_s28 + $0xd60] sm:$0xff]  ;;  %v3184_v21 = vpack.c.bf16 %v690_v13, %v689_v11  ;;  %v660_v24 = vld [vmem:[%s3665_s28 + $0xcf8] sm:$0xff]  ;;  %v3224_v48 = vpack.c.bf16 %v742_v39, %v741_v43  ;;  %v3230_v5 = vpack.c.bf16 %v728_v62, %v727_v58  ;;  %v730_v11 = vld [vmem:[%s3665_s28 + $0xf28] sm:$0xff] }
 0x126   : > { %1907 = vmatprep.mubr.f32.mxu1 %v883_v27  ;;  %v3154_v27 = vpack.c.bf16 %v642_v16, %v641_v19  ;;  %v697_v7 = vld [vmem:[%s3665_s28 + $0xe20] sm:$0xff]  ;;  %v715_v13 = vld [vmem:[%s3665_s28 + $0xeb0] sm:$0xff]  ;;  %v3234_v19 = vpack.c.bf16 %v730_v11, %v729_v8  ;;  %v720_v43 = vld [vmem:[%s3665_s28 + $0xed8] sm:$0xff] }
 0x127   : > { %3135 = vmatpush3.bf16.msra.mxu0 %v3134_v28  ;;  %v244_v28 = vld [vmem:[%s3659_s4 + $0x38] sm:$0xff]  ;;  %v751_v39 = vld [vmem:[%s3665_s28 + $0xfd0] sm:$0xff]  ;;  %v722_v51 = vld [vmem:[%s3665_s28 + $0xee8] sm:$0xff] }
 0x128   : > { %3167 = vmatpush3.bf16.msra.mxu1 %v3166_v29  ;;  %3137 = vmatprep.subr.bf16.mxu0 %v3136_v30  ;;  %v3186_v29 = vpack.c.bf16 %v674_v22, %v673_v20  ;;  %v3156_v30 = vpack.c.bf16 %v660_v24, %v659_v23  ;;  %v4221_v52 = vrot.slane %v244_v28, %v3730_v14  ;;  %v699_v20 = vld [vmem:[%s3665_s28 + $0xe30] sm:$0xff]  ;;  %v732_v24 = vld [vmem:[%s3665_s28 + $0xf38] sm:$0xff]  ;;  %v737_v58 = vld [vmem:[%s3665_s28 + $0xf60] sm:$0xff] }
 0x129   : > { %3169 = vmatprep.subr.bf16.mxu1 %v3168_v35  ;;  %v3188_v35 = vpack.c.bf16 %v692_v26, %v691_v25  ;;  %v731_v22 = vld [vmem:[%s3665_s28 + $0xf30] sm:$0xff]  ;;  %v717_v25 = vld [vmem:[%s3665_s28 + $0xec0] sm:$0xff]  ;;  %v718_v26 = vld [vmem:[%s3665_s28 + $0xec8] sm:$0xff] }
 0x12a   : > { %v707_v11 = vld [vmem:[%s3665_s28 + $0xe70] sm:$0xff] }
 0x12b   : > { %3139 = vmatpush3.bf16.msra.mxu0 %v3138_v40  ;;  %v884_v40 = vcombine.high %v244_v28, %v244_v28  ;;  %v750_v28 = vld [vmem:[%s3665_s28 + $0xfc8] sm:$0xff] }
 0x12c   : > { %3171 = vmatpush3.bf16.msra.mxu1 %v3170_v53  ;;  %3141 = vmatprep.subr.bf16.mxu0 %v3140_v41  ;;  %v3158_v53 = vpack.c.bf16 %v644_v32, %v643_v31  ;;  %v3190_v41 = vpack.c.bf16 %v676_v36, %v675_v33  ;;  %v3208_v31 = vpack.c.bf16 %v718_v26, %v717_v25  ;;  %v701_v32 = vld [vmem:[%s3665_s28 + $0xe40] sm:$0xff]  ;;  %v702_v33 = vld [vmem:[%s3665_s28 + $0xe48] sm:$0xff] }
 0x12d   : > { %3173 = vmatprep.subr.bf16.mxu1 %v3172_v47  ;;  %v725_v47 = vld [vmem:[%s3665_s28 + $0xf00] sm:$0xff] }
 0x12e   : > { %v3226_v57 = vpack.c.bf16 %v726_v49, %v725_v47  ;;  %v735_v47 = vld [vmem:[%s3665_s28 + $0xf50] sm:$0xff]  ;;  %v736_v49 = vld [vmem:[%s3665_s28 + $0xf58] sm:$0xff] }
 0x12f   : > { %3143 = vmatpush3.bf16.msra.mxu0 %v3142_v54  ;;  %v743_v54 = vld [vmem:[%s3665_s28 + $0xf90] sm:$0xff] }
 0x130   : > { %3175 = vmatpush3.bf16.msra.mxu1 %v3174_v34  ;;  %3145 = vmatprep.subr.bf16.mxu0 %v3144_v55  ;;  %v744_v34 = vld [vmem:[%s3665_s28 + $0xf98] sm:$0xff]  ;;  %v4226_v55 = vrot.slane %v884_v40, %v3730_v14  ;;  %v714_v14 = vld [vmem:[%s3665_s28 + $0xea8] sm:$0xff] }
 0x131   : > { %3177 = vmatprep.subr.bf16.mxu1 %v3176_v60  ;;  %v695_v60 = vld [vmem:[%s3665_s28 + $0xe10] sm:$0xff]  ;;  %v3228_v46 = vpack.c.bf16 %v744_v34, %v743_v54  ;;  %v752_v40 = vld [vmem:[%s3665_s28 + $0xfd8] sm:$0xff]  ;;  %v753_v54 = vld [vmem:[%s3665_s28 + $0xfe0] sm:$0xff] }
 0x132   : > { %v900_v3 = vcombine.high %v4226_v55, %v4226_v55  ;;  %v3198_v4 = vpack.c.bf16 %v696_v61, %v695_v60  ;;  %v754_v34 = vld [vmem:[%s3665_s28 + $0xfe8] sm:$0xff]  ;;  %v705_v60 = vld [vmem:[%s3665_s28 + $0xe60] sm:$0xff] }
 0x133   : > { %3147 = vmatpush3.bf16.msra.mxu0 %v3146_v0  ;;  %v899_v0 = vcombine.high %v4221_v52, %v4221_v52  ;;  %v706_v61 = vld [vmem:[%s3665_s28 + $0xe68] sm:$0xff]  ;;  %v3248_v62 = vpack.c.bf16 %v754_v34, %v753_v54 }
 0x134   : > { %3179 = vmatpush3.bf16.msra.mxu1 %v3178_v1  ;;  %3149 = vmatprep.subr.bf16.mxu0 %v3148_v2  ;;  %v745_v1 = vld [vmem:[%s3665_s28 + $0xfa0] sm:$0xff]  ;;  %v746_v2 = vld [vmem:[%s3665_s28 + $0xfa8] sm:$0xff] }
 0x135   : > { %3181 = vmatprep.subr.bf16.mxu1 %v3180_v6  ;;  %v3200_v6 = vpack.c.bf16 %v714_v14, %v713_v63  ;;  %v3232_v10 = vpack.c.bf16 %v746_v2, %v745_v1  ;;  %v738_v63 = vld [vmem:[%s3665_s28 + $0xf68] sm:$0xff]  ;;  %v723_v14 = vld [vmem:[%s3665_s28 + $0xef0] sm:$0xff] }
 0x136   : > { %v3250_v8 = vpack.c.bf16 %v738_v63, %v737_v58 }
 0x137   : > { %3151 = vmatpush3.bf16.msra.mxu0 %v3150_v15  ;;  %v716_v15 = vld [vmem:[%s3665_s28 + $0xeb8] sm:$0xff] }
 0x138   : > { %3183 = vmatpush3.bf16.msra.mxu1 %v3182_v17  ;;  %3153 = vmatprep.subr.bf16.mxu0 %v3152_v18  ;;  %v748_v17 = vld [vmem:[%s3665_s28 + $0xfb8] sm:$0xff]  ;;  %v3204_v16 = vpack.c.bf16 %v716_v15, %v715_v13 }
 0x139   : > { %3185 = vmatprep.subr.bf16.mxu1 %v3184_v21  ;;  %v700_v21 = vld [vmem:[%s3665_s28 + $0xe38] sm:$0xff] }
 0x13a   : > { %v708_v13 = vld [vmem:[%s3665_s28 + $0xe78] sm:$0xff] }
 0x13b   : > { %3155 = vmatpush3.bf16.msra.mxu0 %v3154_v27  ;;  %v749_v27 = vld [vmem:[%s3665_s28 + $0xfc0] sm:$0xff] }
 0x13c   : > { %3187 = vmatpush3.bf16.msra.mxu1 %v3186_v29  ;;  %3157 = vmatprep.subr.bf16.mxu0 %v3156_v30  ;;  %v3206_v29 = vpack.c.bf16 %v700_v21, %v699_v20  ;;  %v3238_v30 = vpack.c.bf16 %v732_v24, %v731_v22  ;;  %v3240_v36 = vpack.c.bf16 %v750_v28, %v749_v27 }
 0x13d   : > { %3189 = vmatprep.subr.bf16.mxu1 %v3188_v35  ;;  %v733_v35 = vld [vmem:[%s3665_s28 + $0xf40] sm:$0xff] }
 0x13f   : > { %3159 = vmatpush3.bf16.msra.mxu0 %v3158_v53  ;;  %v3210_v53 = vpack.c.bf16 %v702_v33, %v701_v32 }
 0x140   : > { %3191 = vmatpush3.bf16.msra.mxu1 %v3190_v41  ;;  %3193 = vmatprep.subr.bf16.mxu0 %v3192_v42  ;;  %v3242_v41 = vpack.c.bf16 %v734_v37, %v733_v35  ;;  %v3212_v42 = vpack.c.bf16 %v720_v43, %v719_v38 }
 0x141   : > { %3225 = vmatprep.subr.bf16.mxu1 %v3224_v48  ;;  %v3244_v48 = vpack.c.bf16 %v752_v40, %v751_v39 }
 0x142   : > { %1838 = vmatmul.mubr.f32.vlgmr.msra.gmra.mrb[12].mxu0 %v4144_v9  ;;  %v698_v9 = vld [vmem:[%s3665_s28 + $0xe28] sm:$0xff] }
 0x143   : > { %3195 = vmatpush3.bf16.msra.mxu0 %v3194_v56  ;;  %1908 = vmatmul.mubr.f32.vlgmr.msra.gmra.mrb[12].mxu1 %v4149_v12  ;;  %v747_v12 = vld [vmem:[%s3665_s28 + $0xfb0] sm:$0xff]  ;;  %v3202_v18 = vpack.c.bf16 %v698_v9, %v697_v7  ;;  %v3214_v56 = vpack.c.bf16 %v704_v45, %v703_v44  ;;  %v3218_v7 = vpack.c.bf16 %v706_v61, %v705_v60 }
 0x144   : > { %3227 = vmatpush3.bf16.msra.mxu1 %v3226_v57  ;;  %3197 = vmatprep.subr.bf16.mxu0 %v3196_v59  ;;  %v3236_v23 = vpack.c.bf16 %v748_v17, %v747_v12  ;;  %v3246_v57 = vpack.c.bf16 %v736_v49, %v735_v47  ;;  %v3216_v59 = vpack.c.bf16 %v722_v51, %v721_v50  ;;  %v739_v12 = vld [vmem:[%s3665_s28 + $0xf70] sm:$0xff]  ;;  %v740_v17 = vld [vmem:[%s3665_s28 + $0xf78] sm:$0xff] }
 0x145   : > { %3229 = vmatprep.subr.bf16.mxu1 %v3228_v46  ;;  %1977 = vmatprep.mubr.f32.mxu0 %v899_v0  ;;  %v724_v0 = vld [vmem:[%s3665_s28 + $0xef8] sm:$0xff] }
 0x146   : > { %2047 = vmatprep.mubr.f32.mxu1 %v900_v3  ;;  %v755_v3 = vld [vmem:[%s3665_s28 + $0xff0] sm:$0xff] }
 0x147   : > { %3199 = vmatpush3.bf16.msra.mxu0 %v3198_v4  ;;  %v756_v4 = vld [vmem:[%s3665_s28 + $0xff8] sm:$0xff] }
 0x148   : > { %3231 = vmatpush3.bf16.msra.mxu1 %v3230_v5  ;;  %3201 = vmatprep.subr.bf16.mxu0 %v3200_v6  ;;  %v3252_v15 = vpack.c.bf16 %v756_v4, %v755_v3 }
 0x149   : > { %3233 = vmatprep.subr.bf16.mxu1 %v3232_v10  ;;  %v3220_v10 = vpack.c.bf16 %v724_v0, %v723_v14 }
 0x14b   : > { %3203 = vmatpush3.bf16.msra.mxu0 %v3202_v18 }
 0x14c   : > { %3235 = vmatpush3.bf16.msra.mxu1 %v3234_v19  ;;  %3205 = vmatprep.subr.bf16.mxu0 %v3204_v16  ;;  %v3222_v19 = vpack.c.bf16 %v708_v13, %v707_v11  ;;  %v3254_v16 = vpack.c.bf16 %v740_v17, %v739_v12 }
 0x14d   : > { %3237 = vmatprep.subr.bf16.mxu1 %v3236_v23 }
 0x14f   : > { %3207 = vmatpush3.bf16.msra.mxu0 %v3206_v29 }
 0x150   : > { %3239 = vmatpush3.bf16.msra.mxu1 %v3238_v30  ;;  %3209 = vmatprep.subr.bf16.mxu0 %v3208_v31 }
 0x151   : > { %3241 = vmatprep.subr.bf16.mxu1 %v3240_v36 }
 0x153   : > { %3211 = vmatpush3.bf16.msra.mxu0 %v3210_v53 }
 0x154   : > { %3243 = vmatpush3.bf16.msra.mxu1 %v3242_v41  ;;  %3213 = vmatprep.subr.bf16.mxu0 %v3212_v42 }
 0x155   : > { %v2216_v46 = vpop.f32.mrb[0].mxu0  ;;  %3245 = vmatprep.subr.bf16.mxu1 %v3244_v48 }
 0x156   : > { %v2251_v1 = vpop.f32.mrb[0].mxu1  ;;  %v2217_v2 = vpop.f32.mrb[1].mxu0 }
 0x157   : > { %v2218_v5 = vadd.f32 %v2217_v2, %v2216_v46  ;;  %v2252_v6 = vpop.f32.mrb[1].mxu1  ;;  %3215 = vmatpush3.bf16.msra.mxu0 %v3214_v56 }
 0x158   : > { %v2253_v9 = vadd.f32 %v2252_v6, %v2251_v1  ;;  %3247 = vmatpush3.bf16.msra.mxu1 %v3246_v57  ;;  %3217 = vmatprep.subr.bf16.mxu0 %v3216_v59 }
 0x159   : > { %3249 = vmatprep.subr.bf16.mxu1 %v3248_v62 }
 0x15a   : > { %v1070_v18 = vadd.f32 %v2253_v9, %v2218_v5 }
 0x15b   : > { %3219 = vmatpush3.bf16.msra.mxu0 %v3218_v7 }
 0x15c   : > { %3251 = vmatpush3.bf16.msra.mxu1 %v3250_v8  ;;  %3221 = vmatprep.subr.bf16.mxu0 %v3220_v10  ;;  %v236_v10 = vld [vmem:[%s3676_s6] sm:$0x3] }
 0x15d   : > { %3253 = vmatprep.subr.bf16.mxu1 %v3252_v15 }
 0x15f   : > { %3223 = vmatpush3.bf16.msra.mxu0 %v3222_v19 }
 0x160   : > { %3255 = vmatpush3.bf16.msra.mxu1 %v3254_v16 }
 0x162   : > { %1978 = vmatmul.mubr.f32.vlgmr.msra.gmra.mrb[14].mxu0 %v4221_v52 }
 0x163   : > { %2048 = vmatmul.mubr.f32.vlgmr.msra.gmra.mrb[14].mxu1 %v4226_v55 }
 0x175   : > { %v2286_v20 = vpop.f32.mrb[2].mxu0 }
 0x176   : > { %v2287_v21 = vpop.f32.mrb[3].mxu0  ;;  %v2321_v22 = vpop.f32.mrb[2].mxu1 }
 0x177   : > { %v2288_v23 = vadd.f32 %v2287_v21, %v2286_v20  ;;  %v2322_v24 = vpop.f32.mrb[3].mxu1 }
 0x178   : > { %v2323_v25 = vadd.f32 %v2322_v24, %v2321_v22 }
 0x179   : > { %v1140_v26 = vadd.f32 %v2288_v23, %v1070_v18 }
 0x17b   : > { %v1210_v27 = vadd.f32 %v2323_v25, %v1140_v26 }
 0x195   : > { %v2356_v28 = vpop.f32.mrb[4].mxu0 }
 0x196   : > { %v2357_v29 = vpop.f32.mrb[5].mxu0  ;;  %v2391_v30 = vpop.f32.mrb[4].mxu1 }
 0x197   : > { %v2358_v31 = vadd.f32 %v2357_v29, %v2356_v28  ;;  %v2392_v32 = vpop.f32.mrb[5].mxu1 }
 0x198   : > { %v2393_v33 = vadd.f32 %v2392_v32, %v2391_v30 }
 0x199   : > { %v1280_v35 = vadd.f32 %v2358_v31, %v1210_v27 }
 0x19b   : > { %v1350_v36 = vadd.f32 %v2393_v33, %v1280_v35 }
 0x1b5   : > { %v2426_v37 = vpop.f32.mrb[6].mxu0 }
 0x1b6   : > { %v2427_v52 = vpop.f32.mrb[7].mxu0  ;;  %v2461_v38 = vpop.f32.mrb[6].mxu1 }
 0x1b7   : > { %v2428_v55 = vadd.f32 %v2427_v52, %v2426_v37  ;;  %v2462_v43 = vpop.f32.mrb[7].mxu1 }
 0x1b8   : > { %v2463_v39 = vadd.f32 %v2462_v43, %v2461_v38 }
 0x1b9   : > { %v1420_v40 = vadd.f32 %v2428_v55, %v1350_v36 }
 0x1bb   : > { %v1490_v53 = vadd.f32 %v2463_v39, %v1420_v40 }
 0x1d5   : > { %v2496_v41 = vpop.f32.mrb[8].mxu0 }
 0x1d6   : > { %v2497_v42 = vpop.f32.mrb[9].mxu0  ;;  %v2531_v44 = vpop.f32.mrb[8].mxu1 }
 0x1d7   : > { %v2498_v45 = vadd.f32 %v2497_v42, %v2496_v41  ;;  %v2532_v47 = vpop.f32.mrb[9].mxu1 }
 0x1d8   : > { %v2533_v48 = vadd.f32 %v2532_v47, %v2531_v44 }
 0x1d9   : > { %v1560_v49 = vadd.f32 %v2498_v45, %v1490_v53 }
 0x1db   : > { %v1630_v50 = vadd.f32 %v2533_v48, %v1560_v49 }
 0x1f5   : > { %v2566_v51 = vpop.f32.mrb[10].mxu0 }
 0x1f6   : > { %v2567_v54 = vpop.f32.mrb[11].mxu0  ;;  %v2601_v34 = vpop.f32.mrb[10].mxu1 }
 0x1f7   : > { %v2568_v56 = vadd.f32 %v2567_v54, %v2566_v51  ;;  %v2602_v57 = vpop.f32.mrb[11].mxu1 }
 0x1f8   : > { %v2603_v59 = vadd.f32 %v2602_v57, %v2601_v34 }
 0x1f9   : > { %v1700_v60 = vadd.f32 %v2568_v56, %v1630_v50 }
 0x1fb   : > { %v1770_v61 = vadd.f32 %v2603_v59, %v1700_v60 }
 0x215   : > { %v2636_v58 = vpop.f32.mrb[12].mxu0 }
 0x216   : > { %v2637_v46 = vpop.f32.mrb[13].mxu0  ;;  %v2671_v62 = vpop.f32.mrb[12].mxu1 }
 0x217   : > { %v2638_v63 = vadd.f32 %v2637_v46, %v2636_v58  ;;  %v2672_v14 = vpop.f32.mrb[13].mxu1 }
 0x218   : > { %v2673_v0 = vadd.f32 %v2672_v14, %v2671_v62 }
 0x219   : > { %v1840_v1 = vadd.f32 %v2638_v63, %v1770_v61 }
 0x21b   : > { %v1910_v2 = vadd.f32 %v2673_v0, %v1840_v1 }
 0x235   : > { %v2706_v3 = vpop.f32.mrb[14].mxu0 }
 0x236   : > { %v2707_v4 = vpop.f32.mrb[15].mxu0  ;;  %v2741_v5 = vpop.f32.mrb[14].mxu1 }
 0x237   : > { %v2708_v6 = vadd.f32 %v2707_v4, %v2706_v3  ;;  %v2742_v7 = vpop.f32.mrb[15].mxu1 }
 0x238   : > { %v2743_v9 = vadd.f32 %v2742_v7, %v2741_v5 }
 0x239   : > { %v1980_v8 = vadd.f32 %v2708_v6, %v1910_v2 }
 0x23b   : > { %v2050_v11 = vadd.f32 %v2743_v9, %v1980_v8 }
 0x23d   : > { %v2053_v13 = vadd.f32 %v2050_v11, %v236_v10 }
 0x23f   : > { %2055 = vst.msk [vmem:[%s3676_s6] sm:$0x3] %vm2054_vm1, %v2053_v13 }
 0x240 PF: > { %s18_s16 = sadd.s32 1, %s3474_s16   ;;  %s4324_s9 = smov %s3450_s10 }
 0x241   : > { %p15_p5 = scmp.ge.s32.totalorder %s18_s16, 6   ;;  %s4325_s10 = smov %s3454_s11 }
 0x242   : > { %s4326_s11 = smov %s3570_s3  ;;  %s4327_s12 = smov %s3466_s14 }
 0x243   : > { %s4328_s13 = smov %s3470_s15  ;;  %s4329_s14 = smov %s4332_s18 }
 0x244   : > { %s4330_s15 = smov %s4336_s19  ;;  %17 = sbr.rel (!%p15_p5) target bundleno = 7 (0x7), region = 85 }
 0x24b   :  { %2075 = vsyncpa [#allocation3], 1 }
 0x24c   :  { %2077 = vsyncpa [#allocation3 + $0x1], 1 }
 0x24d   :  { %2078 = vsyncpa [#allocation5], 1 }
 0x24e   :  { %2080 = vsyncpa [#allocation5 + $0x1], 1 }

</bundles_post_ra>
